<compile_context>
chip_gen: v5e
topology: v5e:2x2
jax: 0.10.0
libtpu: 0.0.40
codegen_flags: <defaults>
</compile_context>

<pallas_src>
import jax
import jax.numpy as jnp
from jax.experimental import pallas as pl
from jax.experimental.pallas import tpu as pltpu


# ---------------------------------------------------------------------------
# Kernels
# ---------------------------------------------------------------------------
def _couple_kernel_separate(z_ref, mask_ref,
                            sw1_ref, sb1_ref, sw2_ref, sb2_ref, sw3_ref, sb3_ref,
                            tw1_ref, tb1_ref, tw2_ref, tb2_ref, tw3_ref, tb3_ref,
                            zout_ref, sout_ref):
    """Six separate 128-wide matmuls (best on v5e, correct everywhere)."""
    z = z_ref[...].astype(jnp.float32)           # (tb, D)
    mask = mask_ref[...].astype(jnp.float32)     # (1, D) broadcast over batch
    omm = 1.0 - mask

    z_masked = mask * z                          # z_ = mask * z
    zm_bf = z_masked.astype(jnp.bfloat16)        # bf16 operands, f32 accumulate

    def mlp3(w1, b1, w2, b2, w3, b3):
        h = jnp.dot(zm_bf, w1[...], preferred_element_type=jnp.float32) + b1[...]
        h = jnp.maximum(h, 0.0).astype(jnp.bfloat16)
        h = jnp.dot(h, w2[...], preferred_element_type=jnp.float32) + b2[...]
        h = jnp.maximum(h, 0.0).astype(jnp.bfloat16)
        return jnp.dot(h, w3[...], preferred_element_type=jnp.float32) + b3[...]

    s = jnp.tanh(mlp3(sw1_ref, sb1_ref, sw2_ref, sb2_ref, sw3_ref, sb3_ref)) * omm
    t = mlp3(tw1_ref, tb1_ref, tw2_ref, tb2_ref, tw3_ref, tb3_ref) * omm

    # z = (1 - mask) * (z - t) * exp(-s) + z_
    zout_ref[...] = (omm * (z - t) * jnp.exp(-s) + z_masked).astype(zout_ref.dtype)
    sout_ref[...] = s.astype(sout_ref.dtype)


def _couple_kernel_fused(z_ref, mask_ref,
                         w1_ref, b1_ref, w2_ref, b2_ref, w3_ref, b3_ref,
                         zout_ref, sout_ref):
    """Scale + translation nets fused into 256-wide matmuls (v6e/v7x MXU)."""
    D = z_ref.shape[-1]
    z = z_ref[...].astype(jnp.float32)           # (tb, D)
    mask = mask_ref[...].astype(jnp.float32)     # (1, D)
    omm = 1.0 - mask

    z_masked = mask * z
    h = jnp.dot(z_masked.astype(jnp.bfloat16), w1_ref[...],
                preferred_element_type=jnp.float32) + b1_ref[...]        # (tb, 2H)
    h = jnp.maximum(h, 0.0).astype(jnp.bfloat16)
    h = jnp.dot(h, w2_ref[...], preferred_element_type=jnp.float32) + b2_ref[...]
    h = jnp.maximum(h, 0.0).astype(jnp.bfloat16)
    out = jnp.dot(h, w3_ref[...], preferred_element_type=jnp.float32) + b3_ref[...]  # (tb, 2D)

    s = jnp.tanh(out[:, :D]) * omm               # scale head
    t = out[:, D:] * omm                         # translation head

    zout_ref[...] = (omm * (z - t) * jnp.exp(-s) + z_masked).astype(zout_ref.dtype)
    sout_ref[...] = s.astype(sout_ref.dtype)


# ---------------------------------------------------------------------------
# Wrapper
# ---------------------------------------------------------------------------
def _should_fuse_nets():
    """Fuse the two coupling nets on 256-wide-MXU chips (v6e / v7x)."""
    try:
        kind = jax.devices()[0].device_kind.lower()
        return any(tag in kind for tag in ("v6", "v7", "7x"))
    except Exception:
        return False


def couple_layer(z, mask, params, *, tb=256, fuse_nets=None):
    """z: (B, D) f32, mask: (1, D) f32, params: dict of MLP weights (f32)."""
    B, D = z.shape
    H = params["sw1"].shape[1]

    if fuse_nets is None:
        # Fusion only pays off when the individual matmuls are <= 128 wide.
        fuse_nets = _should_fuse_nets() and D <= 128 and H <= 128

    # Large batch tile: fill the MXU and amortize per-grid-step overhead.
    tb = min(tb, B)
    pad = (-B) % tb
    z_in = jnp.concatenate([z, jnp.zeros((pad, D), z.dtype)], axis=0) if pad else z
    Bp = B + pad

    wdt = jnp.bfloat16  # matmul operand dtype (f32 accumulation inside kernel)

    z_spec = pl.BlockSpec((tb, D), lambda i: (i, 0))
    full = lambda shape: pl.BlockSpec(shape, lambda i: (0, 0))

    if fuse_nets:
        sw2 = params["sw2"].astype(wdt)
        tw2 = params["tw2"].astype(wdt)
        sw3 = params["sw3"].astype(wdt)
        tw3 = params["tw3"].astype(wdt)
        zHH = jnp.zeros((H, H), wdt)
        zHD = jnp.zeros((H, D), wdt)
        w1 = jnp.concatenate([params["sw1"], params["tw1"]], axis=1).astype(wdt)   # (D, 2H)
        b1 = jnp.concatenate([params["sb1"], params["tb1"]], axis=1)               # (1, 2H)
        w2 = jnp.block([[sw2, zHH], [zHH, tw2]])                                   # (2H, 2H)
        b2 = jnp.concatenate([params["sb2"], params["tb2"]], axis=1)               # (1, 2H)
        w3 = jnp.block([[sw3, zHD], [zHD, tw3]])                                   # (2H, 2D)
        b3 = jnp.concatenate([params["sb3"], params["tb3"]], axis=1)               # (1, 2D)

        kernel = _couple_kernel_fused
        weight_args = (w1, b1, w2, b2, w3, b3)
        in_specs = [
            z_spec, full((1, D)),
            full((D, 2 * H)), full((1, 2 * H)),
            full((2 * H, 2 * H)), full((1, 2 * H)),
            full((2 * H, 2 * D)), full((1, 2 * D)),
        ]
        weight_elems = D * 2 * H + (2 * H) * (2 * H) + (2 * H) * (2 * D)
    else:
        kernel = _couple_kernel_separate
        weight_args = (
            params["sw1"].astype(wdt), params["sb1"],
            params["sw2"].astype(wdt), params["sb2"],
            params["sw3"].astype(wdt), params["sb3"],
            params["tw1"].astype(wdt), params["tb1"],
            params["tw2"].astype(wdt), params["tb2"],
            params["tw3"].astype(wdt), params["tb3"],
        )
        in_specs = [
            z_spec, full((1, D)),
            full((D, H)), full((1, H)),   # scale layer 1
            full((H, H)), full((1, H)),   # scale layer 2
            full((H, D)), full((1, D)),   # scale layer 3
            full((D, H)), full((1, H)),   # train layer 1
            full((H, H)), full((1, H)),   # train layer 2
            full((H, D)), full((1, D)),   # train layer 3
        ]
        weight_elems = 2 * (D * H + H * H + H * D)

    out_specs = (
        pl.BlockSpec((tb, D), lambda i: (i, 0)),
        pl.BlockSpec((tb, D), lambda i: (i, 0)),
    )
    out_shape = (
        jax.ShapeDtypeStruct((Bp, D), z.dtype),
        jax.ShapeDtypeStruct((Bp, D), z.dtype),
    )

    cost = pl.CostEstimate(
        flops=4 * Bp * (2 * D * H + H * H),       # two 3-layer MLPs, mul+add
        transcendentals=2 * Bp * D,               # tanh + exp per output element
        bytes_accessed=(3 * Bp * D * 4            # z in, z_out + s out (f32)
                        + D * 4                   # mask
                        + weight_elems * 2        # bf16 weights
                        + 2 * (2 * H + D) * 4),   # biases (f32)
    )

    fn = pl.pallas_call(
        kernel,
        grid=(Bp // tb,),
        in_specs=in_specs,
        out_specs=out_specs,
        out_shape=out_shape,
        compiler_params=pltpu.CompilerParams(
            dimension_semantics=("parallel",)),
        cost_estimate=cost,
    )
    z_out, s_out = fn(z_in, mask, *weight_args)
    if pad:
        z_out = z_out[:B]
        s_out = s_out[:B]
    return z_out, s_out


# ---------------------------------------------------------------------------
# Pure-JAX reference (f32 throughout) for a sanity check
# ---------------------------------------------------------------------------
def _reference(z, mask, p):
    z_ = mask * z
    h = jnp.maximum(z_ @ p["sw1"] + p["sb1"], 0.0)
    h = jnp.maximum(h @ p["sw2"] + p["sb2"], 0.0)
    s = jnp.tanh(h @ p["sw3"] + p["sb3"]) * (1.0 - mask)
    g = jnp.maximum(z_ @ p["tw1"] + p["tb1"], 0.0)
    g = jnp.maximum(g @ p["tw2"] + p["tb2"], 0.0)
    t = (g @ p["tw3"] + p["tb3"]) * (1.0 - mask)
    z_out = (1.0 - mask) * (z - t) * jnp.exp(-s) + z_
    return z_out, s


if __name__ == "__main__":
    # Small, lane-friendly shapes (D/H multiples of 128); B large enough to
    # exercise the 256-row batch tile and a multi-step grid.
    B, D, H = 512, 128, 128
    key = jax.random.PRNGKey(0)
    keys = jax.random.split(key, 16)

    def init_w(k, shape, scale=0.05):
        return (scale * jax.random.normal(k, shape)).astype(jnp.float32)

    params = {
        "sw1": init_w(keys[0], (D, H)), "sb1": init_w(keys[1], (1, H)),
        "sw2": init_w(keys[2], (H, H)), "sb2": init_w(keys[3], (1, H)),
        "sw3": init_w(keys[4], (H, D)), "sb3": init_w(keys[5], (1, D)),
        "tw1": init_w(keys[6], (D, H)), "tb1": init_w(keys[7], (1, H)),
        "tw2": init_w(keys[8], (H, H)), "tb2": init_w(keys[9], (1, H)),
        "tw3": init_w(keys[10], (H, D)), "tb3": init_w(keys[11], (1, D)),
    }

    z = jax.random.normal(keys[12], (B, D), dtype=jnp.float32)
    # Checkerboard mask over the feature dim, broadcast over batch (as in PyTorch).
    mask = (jnp.arange(D) % 2).astype(jnp.float32).reshape(1, D)

    z_out, s_out = couple_layer(z, mask, params)
    jax.block_until_ready((z_out, s_out))

    z_ref, s_ref = _reference(z, mask, params)
    # bf16 matmul operands (f32 accumulation) -> loosened tolerance vs f32 reference.
    assert jnp.allclose(z_out, z_ref, atol=2e-2, rtol=2e-2)
    assert jnp.allclose(s_out, s_ref, atol=2e-2, rtol=2e-2)

    print("KERNEL_OK")
</pallas_src>

<mosaic_0001>
module attributes {stable_mosaic.version = 11 : i64} {
  func.func @_couple_kernel_separate(%arg0: i32, %arg1: memref<256x128xf32, #tpu.memory_space<vmem>>, %arg2: memref<1x128xf32, #tpu.memory_space<vmem>>, %arg3: memref<128x128xbf16, #tpu.memory_space<vmem>>, %arg4: memref<1x128xf32, #tpu.memory_space<vmem>>, %arg5: memref<128x128xbf16, #tpu.memory_space<vmem>>, %arg6: memref<1x128xf32, #tpu.memory_space<vmem>>, %arg7: memref<128x128xbf16, #tpu.memory_space<vmem>>, %arg8: memref<1x128xf32, #tpu.memory_space<vmem>>, %arg9: memref<128x128xbf16, #tpu.memory_space<vmem>>, %arg10: memref<1x128xf32, #tpu.memory_space<vmem>>, %arg11: memref<128x128xbf16, #tpu.memory_space<vmem>>, %arg12: memref<1x128xf32, #tpu.memory_space<vmem>>, %arg13: memref<128x128xbf16, #tpu.memory_space<vmem>>, %arg14: memref<1x128xf32, #tpu.memory_space<vmem>>, %arg15: memref<256x128xf32, #tpu.memory_space<vmem>>, %arg16: memref<256x128xf32, #tpu.memory_space<vmem>>) attributes {dimension_semantics = [#tpu.dimension_semantics<parallel>], iteration_bounds = array<i64: 2>, scalar_prefetch = 0 : i64, scratch_operands = 0 : i64, tpu.core_type = #tpu.core_type<tc>, window_params = [{transform_indices = @transform_0, window_bounds = array<i64: 256, 128>}, {pipeline_mode = #tpu.pipeline_mode<synchronous>, transform_indices = @transform_1, window_bounds = array<i64: 1, 128>}, {pipeline_mode = #tpu.pipeline_mode<synchronous>, transform_indices = @transform_2, window_bounds = array<i64: 128, 128>}, {pipeline_mode = #tpu.pipeline_mode<synchronous>, transform_indices = @transform_3, window_bounds = array<i64: 1, 128>}, {pipeline_mode = #tpu.pipeline_mode<synchronous>, transform_indices = @transform_4, window_bounds = array<i64: 128, 128>}, {pipeline_mode = #tpu.pipeline_mode<synchronous>, transform_indices = @transform_5, window_bounds = array<i64: 1, 128>}, {pipeline_mode = #tpu.pipeline_mode<synchronous>, transform_indices = @transform_6, window_bounds = array<i64: 128, 128>}, {pipeline_mode = #tpu.pipeline_mode<synchronous>, transform_indices = @transform_7, window_bounds = array<i64: 1, 128>}, {pipeline_mode = #tpu.pipeline_mode<synchronous>, transform_indices = @transform_8, window_bounds = array<i64: 128, 128>}, {pipeline_mode = #tpu.pipeline_mode<synchronous>, transform_indices = @transform_9, window_bounds = array<i64: 1, 128>}, {pipeline_mode = #tpu.pipeline_mode<synchronous>, transform_indices = @transform_10, window_bounds = array<i64: 128, 128>}, {pipeline_mode = #tpu.pipeline_mode<synchronous>, transform_indices = @transform_11, window_bounds = array<i64: 1, 128>}, {pipeline_mode = #tpu.pipeline_mode<synchronous>, transform_indices = @transform_12, window_bounds = array<i64: 128, 128>}, {pipeline_mode = #tpu.pipeline_mode<synchronous>, transform_indices = @transform_13, window_bounds = array<i64: 1, 128>}, {transform_indices = @transform_14, window_bounds = array<i64: 256, 128>}, {transform_indices = @transform_15, window_bounds = array<i64: 256, 128>}]} {
    %c0 = arith.constant 0 : index
    %c0_0 = arith.constant 0 : index
    %0 = vector.load %arg1[%c0, %c0_0] : memref<256x128xf32, #tpu.memory_space<vmem>>, vector<256x128xf32>
    %c0_1 = arith.constant 0 : index
    %c0_2 = arith.constant 0 : index
    %1 = vector.load %arg2[%c0_1, %c0_2] : memref<1x128xf32, #tpu.memory_space<vmem>>, vector<1x128xf32>
    %cst = arith.constant 1.000000e+00 : f32
    %2 = vector.broadcast %cst : f32 to vector<1x128xf32>
    %3 = arith.subf %2, %1 : vector<1x128xf32>
    %4 = vector.broadcast %1 : vector<1x128xf32> to vector<256x128xf32>
    %5 = arith.mulf %4, %0 : vector<256x128xf32>
    %6 = arith.truncf %5 : vector<256x128xf32> to vector<256x128xbf16>
    %c0_3 = arith.constant 0 : index
    %c0_4 = arith.constant 0 : index
    %7 = vector.load %arg3[%c0_3, %c0_4] : memref<128x128xbf16, #tpu.memory_space<vmem>>, vector<128x128xbf16>
    %cst_5 = arith.constant dense<0.000000e+00> : vector<256x128xf32>
    %8 = tpu.matmul %6, %7, %cst_5 {dimension_numbers = #tpu.dot_dimension_numbers<[1], [0], [0], [1], [0, 0, 1, 1], [], []>} : vector<256x128xbf16>, vector<128x128xbf16>, vector<256x128xf32> -> vector<256x128xf32>
    %c0_6 = arith.constant 0 : index
    %c0_7 = arith.constant 0 : index
    %9 = vector.load %arg4[%c0_6, %c0_7] : memref<1x128xf32, #tpu.memory_space<vmem>>, vector<1x128xf32>
    %10 = vector.broadcast %9 : vector<1x128xf32> to vector<256x128xf32>
    %11 = arith.addf %8, %10 : vector<256x128xf32>
    %cst_8 = arith.constant 0.000000e+00 : f32
    %12 = vector.broadcast %cst_8 : f32 to vector<256x128xf32>
    %13 = arith.maximumf %11, %12 : vector<256x128xf32>
    %14 = arith.truncf %13 : vector<256x128xf32> to vector<256x128xbf16>
    %c0_9 = arith.constant 0 : index
    %c0_10 = arith.constant 0 : index
    %15 = vector.load %arg5[%c0_9, %c0_10] : memref<128x128xbf16, #tpu.memory_space<vmem>>, vector<128x128xbf16>
    %cst_11 = arith.constant dense<0.000000e+00> : vector<256x128xf32>
    %16 = tpu.matmul %14, %15, %cst_11 {dimension_numbers = #tpu.dot_dimension_numbers<[1], [0], [0], [1], [0, 0, 1, 1], [], []>} : vector<256x128xbf16>, vector<128x128xbf16>, vector<256x128xf32> -> vector<256x128xf32>
    %c0_12 = arith.constant 0 : index
    %c0_13 = arith.constant 0 : index
    %17 = vector.load %arg6[%c0_12, %c0_13] : memref<1x128xf32, #tpu.memory_space<vmem>>, vector<1x128xf32>
    %18 = vector.broadcast %17 : vector<1x128xf32> to vector<256x128xf32>
    %19 = arith.addf %16, %18 : vector<256x128xf32>
    %cst_14 = arith.constant 0.000000e+00 : f32
    %20 = vector.broadcast %cst_14 : f32 to vector<256x128xf32>
    %21 = arith.maximumf %19, %20 : vector<256x128xf32>
    %22 = arith.truncf %21 : vector<256x128xf32> to vector<256x128xbf16>
    %c0_15 = arith.constant 0 : index
    %c0_16 = arith.constant 0 : index
    %23 = vector.load %arg7[%c0_15, %c0_16] : memref<128x128xbf16, #tpu.memory_space<vmem>>, vector<128x128xbf16>
    %cst_17 = arith.constant dense<0.000000e+00> : vector<256x128xf32>
    %24 = tpu.matmul %22, %23, %cst_17 {dimension_numbers = #tpu.dot_dimension_numbers<[1], [0], [0], [1], [0, 0, 1, 1], [], []>} : vector<256x128xbf16>, vector<128x128xbf16>, vector<256x128xf32> -> vector<256x128xf32>
    %c0_18 = arith.constant 0 : index
    %c0_19 = arith.constant 0 : index
    %25 = vector.load %arg8[%c0_18, %c0_19] : memref<1x128xf32, #tpu.memory_space<vmem>>, vector<1x128xf32>
    %26 = vector.broadcast %25 : vector<1x128xf32> to vector<256x128xf32>
    %27 = arith.addf %24, %26 : vector<256x128xf32>
    %28 = math.tanh %27 : vector<256x128xf32>
    %29 = vector.broadcast %3 : vector<1x128xf32> to vector<256x128xf32>
    %30 = arith.mulf %28, %29 : vector<256x128xf32>
    %c0_20 = arith.constant 0 : index
    %c0_21 = arith.constant 0 : index
    %31 = vector.load %arg9[%c0_20, %c0_21] : memref<128x128xbf16, #tpu.memory_space<vmem>>, vector<128x128xbf16>
    %cst_22 = arith.constant dense<0.000000e+00> : vector<256x128xf32>
    %32 = tpu.matmul %6, %31, %cst_22 {dimension_numbers = #tpu.dot_dimension_numbers<[1], [0], [0], [1], [0, 0, 1, 1], [], []>} : vector<256x128xbf16>, vector<128x128xbf16>, vector<256x128xf32> -> vector<256x128xf32>
    %c0_23 = arith.constant 0 : index
    %c0_24 = arith.constant 0 : index
    %33 = vector.load %arg10[%c0_23, %c0_24] : memref<1x128xf32, #tpu.memory_space<vmem>>, vector<1x128xf32>
    %34 = vector.broadcast %33 : vector<1x128xf32> to vector<256x128xf32>
    %35 = arith.addf %32, %34 : vector<256x128xf32>
    %cst_25 = arith.constant 0.000000e+00 : f32
    %36 = vector.broadcast %cst_25 : f32 to vector<256x128xf32>
    %37 = arith.maximumf %35, %36 : vector<256x128xf32>
    %38 = arith.truncf %37 : vector<256x128xf32> to vector<256x128xbf16>
    %c0_26 = arith.constant 0 : index
    %c0_27 = arith.constant 0 : index
    %39 = vector.load %arg11[%c0_26, %c0_27] : memref<128x128xbf16, #tpu.memory_space<vmem>>, vector<128x128xbf16>
    %cst_28 = arith.constant dense<0.000000e+00> : vector<256x128xf32>
    %40 = tpu.matmul %38, %39, %cst_28 {dimension_numbers = #tpu.dot_dimension_numbers<[1], [0], [0], [1], [0, 0, 1, 1], [], []>} : vector<256x128xbf16>, vector<128x128xbf16>, vector<256x128xf32> -> vector<256x128xf32>
    %c0_29 = arith.constant 0 : index
    %c0_30 = arith.constant 0 : index
    %41 = vector.load %arg12[%c0_29, %c0_30] : memref<1x128xf32, #tpu.memory_space<vmem>>, vector<1x128xf32>
    %42 = vector.broadcast %41 : vector<1x128xf32> to vector<256x128xf32>
    %43 = arith.addf %40, %42 : vector<256x128xf32>
    %cst_31 = arith.constant 0.000000e+00 : f32
    %44 = vector.broadcast %cst_31 : f32 to vector<256x128xf32>
    %45 = arith.maximumf %43, %44 : vector<256x128xf32>
    %46 = arith.truncf %45 : vector<256x128xf32> to vector<256x128xbf16>
    %c0_32 = arith.constant 0 : index
    %c0_33 = arith.constant 0 : index
    %47 = vector.load %arg13[%c0_32, %c0_33] : memref<128x128xbf16, #tpu.memory_space<vmem>>, vector<128x128xbf16>
    %cst_34 = arith.constant dense<0.000000e+00> : vector<256x128xf32>
    %48 = tpu.matmul %46, %47, %cst_34 {dimension_numbers = #tpu.dot_dimension_numbers<[1], [0], [0], [1], [0, 0, 1, 1], [], []>} : vector<256x128xbf16>, vector<128x128xbf16>, vector<256x128xf32> -> vector<256x128xf32>
    %c0_35 = arith.constant 0 : index
    %c0_36 = arith.constant 0 : index
    %49 = vector.load %arg14[%c0_35, %c0_36] : memref<1x128xf32, #tpu.memory_space<vmem>>, vector<1x128xf32>
    %50 = vector.broadcast %49 : vector<1x128xf32> to vector<256x128xf32>
    %51 = arith.addf %48, %50 : vector<256x128xf32>
    %52 = vector.broadcast %3 : vector<1x128xf32> to vector<256x128xf32>
    %53 = arith.mulf %51, %52 : vector<256x128xf32>
    %54 = arith.subf %0, %53 : vector<256x128xf32>
    %55 = vector.broadcast %3 : vector<1x128xf32> to vector<256x128xf32>
    %56 = arith.mulf %55, %54 : vector<256x128xf32>
    %cst_37 = arith.constant 0.000000e+00 : f32
    %57 = vector.broadcast %cst_37 : f32 to vector<256x128xf32>
    %58 = arith.subf %57, %30 : vector<256x128xf32>
    %59 = math.exp %58 : vector<256x128xf32>
    %60 = arith.mulf %56, %59 : vector<256x128xf32>
    %61 = arith.addf %60, %5 : vector<256x128xf32>
    %c0_38 = arith.constant 0 : index
    %c0_39 = arith.constant 0 : index
    %62 = vector.load %arg15[%c0_38, %c0_39] : memref<256x128xf32, #tpu.memory_space<vmem>>, vector<256x128xf32>
    tpu.vector_store %arg15[%c0_38, %c0_39], %61 {strides = array<i32>} : memref<256x128xf32, #tpu.memory_space<vmem>>, vector<256x128xf32>,
    %c0_40 = arith.constant 0 : index
    %c0_41 = arith.constant 0 : index
    %63 = vector.load %arg16[%c0_40, %c0_41] : memref<256x128xf32, #tpu.memory_space<vmem>>, vector<256x128xf32>
    tpu.vector_store %arg16[%c0_40, %c0_41], %30 {strides = array<i32>} : memref<256x128xf32, #tpu.memory_space<vmem>>, vector<256x128xf32>,
    return
  }
  func.func @transform_0(%arg0: i32) -> (i32, i32) {
    %c0_i32 = arith.constant 0 : i32
    %c0_i32_0 = arith.constant 0 : i32
    return %arg0, %c0_i32 : i32, i32
  }
  func.func @transform_1(%arg0: i32) -> (i32, i32) {
    %c0_i32 = arith.constant 0 : i32
    %c0_i32_0 = arith.constant 0 : i32
    %c0_i32_1 = arith.constant 0 : i32
    return %c0_i32, %c0_i32_0 : i32, i32
  }
  func.func @transform_2(%arg0: i32) -> (i32, i32) {
    %c0_i32 = arith.constant 0 : i32
    %c0_i32_0 = arith.constant 0 : i32
    %c0_i32_1 = arith.constant 0 : i32
    return %c0_i32, %c0_i32_0 : i32, i32
  }
  func.func @transform_3(%arg0: i32) -> (i32, i32) {
    %c0_i32 = arith.constant 0 : i32
    %c0_i32_0 = arith.constant 0 : i32
    %c0_i32_1 = arith.constant 0 : i32
    return %c0_i32, %c0_i32_0 : i32, i32
  }
  func.func @transform_4(%arg0: i32) -> (i32, i32) {
    %c0_i32 = arith.constant 0 : i32
    %c0_i32_0 = arith.constant 0 : i32
    %c0_i32_1 = arith.constant 0 : i32
    return %c0_i32, %c0_i32_0 : i32, i32
  }
  func.func @transform_5(%arg0: i32) -> (i32, i32) {
    %c0_i32 = arith.constant 0 : i32
    %c0_i32_0 = arith.constant 0 : i32
    %c0_i32_1 = arith.constant 0 : i32
    return %c0_i32, %c0_i32_0 : i32, i32
  }
  func.func @transform_6(%arg0: i32) -> (i32, i32) {
    %c0_i32 = arith.constant 0 : i32
    %c0_i32_0 = arith.constant 0 : i32
    %c0_i32_1 = arith.constant 0 : i32
    return %c0_i32, %c0_i32_0 : i32, i32
  }
  func.func @transform_7(%arg0: i32) -> (i32, i32) {
    %c0_i32 = arith.constant 0 : i32
    %c0_i32_0 = arith.constant 0 : i32
    %c0_i32_1 = arith.constant 0 : i32
    return %c0_i32, %c0_i32_0 : i32, i32
  }
  func.func @transform_8(%arg0: i32) -> (i32, i32) {
    %c0_i32 = arith.constant 0 : i32
    %c0_i32_0 = arith.constant 0 : i32
    %c0_i32_1 = arith.constant 0 : i32
    return %c0_i32, %c0_i32_0 : i32, i32
  }
  func.func @transform_9(%arg0: i32) -> (i32, i32) {
    %c0_i32 = arith.constant 0 : i32
    %c0_i32_0 = arith.constant 0 : i32
    %c0_i32_1 = arith.constant 0 : i32
    return %c0_i32, %c0_i32_0 : i32, i32
  }
  func.func @transform_10(%arg0: i32) -> (i32, i32) {
    %c0_i32 = arith.constant 0 : i32
    %c0_i32_0 = arith.constant 0 : i32
    %c0_i32_1 = arith.constant 0 : i32
    return %c0_i32, %c0_i32_0 : i32, i32
  }
  func.func @transform_11(%arg0: i32) -> (i32, i32) {
    %c0_i32 = arith.constant 0 : i32
    %c0_i32_0 = arith.constant 0 : i32
    %c0_i32_1 = arith.constant 0 : i32
    return %c0_i32, %c0_i32_0 : i32, i32
  }
  func.func @transform_12(%arg0: i32) -> (i32, i32) {
    %c0_i32 = arith.constant 0 : i32
    %c0_i32_0 = arith.constant 0 : i32
    %c0_i32_1 = arith.constant 0 : i32
    return %c0_i32, %c0_i32_0 : i32, i32
  }
  func.func @transform_13(%arg0: i32) -> (i32, i32) {
    %c0_i32 = arith.constant 0 : i32
    %c0_i32_0 = arith.constant 0 : i32
    %c0_i32_1 = arith.constant 0 : i32
    return %c0_i32, %c0_i32_0 : i32, i32
  }
  func.func @transform_14(%arg0: i32) -> (i32, i32) {
    %c0_i32 = arith.constant 0 : i32
    %c0_i32_0 = arith.constant 0 : i32
    return %arg0, %c0_i32 : i32, i32
  }
  func.func @transform_15(%arg0: i32) -> (i32, i32) {
    %c0_i32 = arith.constant 0 : i32
    %c0_i32_0 = arith.constant 0 : i32
    return %arg0, %c0_i32 : i32, i32
  }
}

</mosaic_0001>

<bundles_post_ra>
// kernel: tpu_custom_call.1
= control target key start
LH: loop header
LB: loop body
LE: loop exit
PB: predicated region body
PF: predicated region fallthrough
CT: control target
= control target key end

     0   :  { %s4566_s0 = inlined_call_operand.hbm [shape: f32[512,128], index: 0, kind: input, shape index: {}]   ;;  %s4567_s1 = inlined_call_operand.hbm [shape: f32[1,128], index: 1, kind: input, shape index: {}]   ;;  %s4568_s2 = inlined_call_operand.hbm [shape: bf16[128,128], index: 2, kind: input, shape index: {}]   ;;  %s4569_s3 = inlined_call_operand.vmem [shape: f32[1,128], index: 3, kind: input, shape index: {}]   ;;  %s4570_s4 = inlined_call_operand.hbm [shape: bf16[128,128], index: 4, kind: input, shape index: {}]   ;;  %s4571_s5 = inlined_call_operand.vmem [shape: f32[1,128], index: 5, kind: input, shape index: {}]   ;;  %s4572_s6 = inlined_call_operand.hbm [shape: bf16[128,128], index: 6, kind: input, shape index: {}]   ;;  %s4573_s7 = inlined_call_operand.vmem [shape: f32[1,128], index: 7, kind: input, shape index: {}]   ;;  %s4574_s8 = inlined_call_operand.hbm [shape: bf16[128,128], index: 8, kind: input, shape index: {}]   ;;  %s4575_s9 = inlined_call_operand.vmem [shape: f32[1,128], index: 9, kind: input, shape index: {}]   ;;  %s4576_s10 = inlined_call_operand.hbm [shape: bf16[128,128], index: 10, kind: input, shape index: {}]   ;;  %s4577_s11 = inlined_call_operand.vmem [shape: f32[1,128], index: 11, kind: input, shape index: {}]   ;;  %s4578_s12 = inlined_call_operand.hbm [shape: bf16[128,128], index: 12, kind: input, shape index: {}]   ;;  %s4579_s13 = inlined_call_operand.vmem [shape: f32[1,128], index: 13, kind: input, shape index: {}]   ;;  %s4580_s14 = inlined_call_operand.hbm [shape: f32[512,128], index: 14, kind: output, shape index: {0}]   ;;  %s4581_s15 = inlined_call_operand.hbm [shape: f32[512,128], index: 15, kind: output, shape index: {1}]  }
   0x1   :  { %4603 = sst [smem:[#allocation44_spill]] %s4567_s1 }
   0x2   :  { %4604 = sst [smem:[#allocation45_spill]] %s4568_s2 }
   0x3   :  { %4605 = sst [smem:[#allocation46_spill]] %s4570_s4 }
   0x4   :  { %4606 = sst [smem:[#allocation47_spill]] %s4572_s6 }
   0x5   :  { %4607 = sst [smem:[#allocation48_spill]] %s4574_s8 }
   0x6   :  { %4608 = sst [smem:[#allocation49_spill]] %s4576_s10 }
   0x7   :  { %4609 = sst [smem:[#allocation50_spill]] %s4578_s12 }
   0x8   :  { %4610 = sst [smem:[#allocation51_spill]] %s4579_s13 }
   0x9   :  { %4611 = sst [smem:[#allocation52_spill]] %s4580_s14 }
   0xa   :  { %4612 = sst [smem:[#allocation53_spill]] %s4581_s15 }
   0xb   :  { %21 = vsyncpa [#allocation3], 0 }
   0xc   :  { %23 = vsyncpa [#allocation3 + $0x1], 0 }
   0xd   :  { %24 = vsyncpa [#allocation6], 0 }
   0xe   :  { %25 = vsyncpa [#allocation9], 0 }
   0xf   :  { %26 = vsyncpa [#allocation12], 0 }
  0x10   :  { %27 = vsyncpa [#allocation15], 0 }
  0x11   :  { %28 = vsyncpa [#allocation4], 0 }
  0x12   :  { %30 = vsyncpa [#allocation4 + $0x1], 0 }
  0x13   :  { %31 = vsyncpa [#allocation18], 0 }
  0x14   :  { %33 = vsyncpa [#allocation18 + $0x1], 0  ;;  %s3495_s18 = smov 0   ;;  %s3497_s19 = smov 0  }
  0x15   :  { %s3499_s20 = smov 0   ;;  %s3501_s21 = smov 0  }
  0x16 LB: > { %s4613_s1 = sld [smem:[#allocation44_spill]]  ;;  %s3519_s25 = sadd.s32 4294967295, %s3400_s21   ;;  %s3400_s21 = sphi %s3501_s21, %s4671_s21   ;;  %s3396_s20 = sphi %s3499_s20, %s4670_s20   ;;  %s3392_s19 = sphi %s3497_s19, %s4669_s19   ;;  %s3388_s18 = sphi %s3495_s18, %s4668_s18  }
  0x17   : > { %p2461_p0 = scmp.ge.s32.totalorder %s3400_s21, 1  ;;  %p60_p1 = scmp.eq.s32.totalorder %s3519_s25, 0 }
  0x18   : > { %p395_p2 = scmp.lt.s32.totalorder %s3400_s21, 3  ;;  %s3402_s27 = smov [#allocation5]  }
  0x19   : > { %s409_s28 = sshll.u32 %s3402_s27, 4  ;;  %s4615_s4 = sld [smem:[#allocation46_spill]]  ;;  %s410_s28 = int_to_ptr.vmem [resolvable:$true] %s409_s28 }
  0x1a   : > { %p3524_p3 = pnand %p2461_p0, %p395_p2  ;;  %s4617_s8 = sld [smem:[#allocation48_spill]] }
  0x1b   : > { %s3404_s29 = smov 64   ;;  %s3405_s30 = smov 4  }
  0x1c   : > { %s407_s24 = sshll.u32 %s4613_s1, 4  ;;  %p2785_p5 = pneg %p3524_p3  ;;  %s408_s24 = int_to_ptr.hbm [resolvable:$true] %s407_s24 }
  0x1d   : > { %s3403_s1 = smov [#allocation8]   ;;  %s4618_s2 = sld [smem:[#allocation45_spill]] }
  0x1e   : > { %p3536_p6 = pnand %p2785_p5, %p60_p1  ;;  %s437_s14 = sshll.u32 %s3403_s1, 4  ;;  %s438_s14 = int_to_ptr.vmem [resolvable:$true] %s437_s14 }
  0x1f   : > { %s435_s16 = sshll.u32 %s4615_s4, 4  ;;  %s3406_s22 = smov [#allocation11]   ;;  %s436_s16 = int_to_ptr.hbm [resolvable:$true] %s435_s16 }
  0x20   : > { %s469_s27 = sshll.u32 %s4617_s8, 4  ;;  %s471_s23 = sshll.u32 %s3406_s22, 4  ;;  %s470_s27 = int_to_ptr.hbm [resolvable:$true] %s469_s27  ;;  %s472_s23 = int_to_ptr.vmem [resolvable:$true] %s471_s23 }
  0x21   : > { %2788 = dma.hbm_to_vmem [thread:$0]  (!%p3536_p6), %s408_s24, 16, %s410_s28, [#allocation6]  }
  0x22   : > { %2794 = dma.hbm_to_vmem [thread:$0]  (!%p3536_p6), %s436_s16, 1024, %s438_s14, [#allocation9], %s3404_s29, %s3404_s29, %s3405_s30  }
  0x23   : > { %s418_s13 = sshll.u32 %s4618_s2, 4  ;;  %s3407_s1 = smov [#allocation7]   ;;  %s419_s13 = int_to_ptr.hbm [resolvable:$true] %s418_s13 }
  0x24   : > { %2800 = dma.hbm_to_vmem [thread:$0]  (!%p3536_p6), %s470_s27, 1024, %s472_s23, [#allocation12], %s3404_s29, %s3404_s29, %s3405_s30  }
  0x25   : > { %s420_s24 = sshll.u32 %s3407_s1, 4  ;;  %s4619_s6 = sld [smem:[#allocation47_spill]]  ;;  %s421_s24 = int_to_ptr.vmem [resolvable:$true] %s420_s24 }
  0x26   : > { %2791 = dma.hbm_to_vmem [thread:$0]  (!%p3536_p6), %s419_s13, 1024, %s421_s24, [#allocation6], %s3404_s29, %s3404_s29, %s3405_s30  }
  0x27   : > { %s4620_s10 = sld [smem:[#allocation49_spill]]  ;;  %s3408_s27 = smov [#allocation10]  }
  0x28   : > { %s454_s22 = sshll.u32 %s3408_s27, 4  ;;  %s3409_s8 = smov [#allocation13]   ;;  %s455_s22 = int_to_ptr.vmem [resolvable:$true] %s454_s22 }
  0x29   : > { %s488_s13 = sshll.u32 %s3409_s8, 4  ;;  %s4621_s12 = sld [smem:[#allocation50_spill]]  ;;  %s489_s13 = int_to_ptr.vmem [resolvable:$true] %s488_s13 }
  0x2a   : > { %s3410_s28 = smov [#allocation14]   ;;  %s2460_s4 = sadd.s32 4294967294, %s3400_s21  }
  0x2b   : > { %s452_s14 = sshll.u32 %s4619_s6, 4  ;;  %s3589_s15 = sadd.s32 1, %s3400_s21   ;;  %s453_s14 = int_to_ptr.hbm [resolvable:$true] %s452_s14 }
  0x2c   : > { %2797 = dma.hbm_to_vmem [thread:$0]  (!%p3536_p6), %s453_s14, 1024, %s455_s22, [#allocation9], %s3404_s29, %s3404_s29, %s3405_s30  }
  0x2d   : > { %s486_s16 = sshll.u32 %s4620_s10, 4  ;;  %s505_s14 = sshll.u32 %s3410_s28, 4  ;;  %s487_s16 = int_to_ptr.hbm [resolvable:$true] %s486_s16  ;;  %s506_s14 = int_to_ptr.vmem [resolvable:$true] %s505_s14 }
  0x2e   : > { %2803 = dma.hbm_to_vmem [thread:$0]  (!%p3536_p6), %s487_s16, 1024, %s489_s13, [#allocation12], %s3404_s29, %s3404_s29, %s3405_s30  }
  0x2f   : > { %s503_s24 = sshll.u32 %s4621_s12, 4  ;;  %s46_s27 = sadd.s32 1, %s3396_s20  ;;  %s504_s24 = int_to_ptr.hbm [resolvable:$true] %s503_s24 }
  0x30   : > { %2806 = dma.hbm_to_vmem [thread:$0]  (!%p3536_p6), %s504_s24, 1024, %s506_s14, [#allocation15], %s3404_s29, %s3404_s29, %s3405_s30  }
  0x31   : > { %s43_s22 = ssub.s32 %s3400_s21, %s3589_s15  ;;  %p53_p7 = scmp.ne.s32.totalorder %s3396_s20, %s3392_s19 }
  0x32   : > { %p44_p8 = scmp.eq.s32.totalorder %s43_s22, 0  ;;  %p54_p9 = scmp.eq.s32.totalorder %s3400_s21, 0 }
  0x33   : > { %p59_p10 = scmp.ne.s32.totalorder %s3392_s19, %s3388_s18  ;;  %p356_p11 = scmp.eq.s32.totalorder %s3519_s25, 1 }
  0x34   : > { %s3601_s16 = scalar_select %p44_p8, %s3396_s20, %s46_s27  }
  0x35   : > { %p3603_p12 = por %p54_p9, %p53_p7  ;;  %p3609_p13 = por %p60_p1, %p59_p10 }
  0x36   : > { %p3613_p0 = por %p356_p11, %p53_p7  ;;  %p362_p2 = scmp.eq.s32.totalorder %s2460_s4, 1 }
  0x37   : > { %p2825_p5 = scmp.lt.s32.totalorder %s3400_s21, 2  ;;  %s522_s8 = sand.u32 1, %s3396_s20  }
  0x38   : > { %p3619_p6 = por %p362_p2, %p59_p10  ;;  %s2470_s23 = sshll.u32 %s522_s8, 8 }
  0x39   : > { %s2684_s1 = sshll.u32 %s3400_s21, 8  ;;  %s526_s22 = scalar_lea.vmem [#allocation2], %s2470_s23 }
  0x3a   : > { %s531_s14 = scalar_lea.hbm %s4566_s0, %s2684_s1  ;;  %s534_s2 = sshll.u32 %s526_s22, 4  ;;  %s535_s2 = int_to_ptr.vmem [resolvable:$true] %s534_s2 }
  0x3b   : > { %s532_s27 = sshll.u32 %s531_s14, 4  ;;  %p3629_p7 = pnand %p2825_p5, %p3603_p12  ;;  %s533_s27 = int_to_ptr.hbm [resolvable:$true] %s532_s27 }
  0x3c   : > { %s523_s6 = scalar_lea.sflag [#allocation3], %s522_s8  ;;  %s3256_s10 = sshra.s32 %s533_s27, 4  ;;  %s3257_s10 = int_to_ptr.hbm [resolvable:$true] %s3256_s10 }
  0x3d   : > { %s3258_s12 = scalar_lea.hbm %s3257_s10, 256  ;;  %p3260_p9 = pneg %p3629_p7 }
  0x3e   : > { %p3259_p8 = scmp.ne.s32.totalorder %s3257_s10, %s3258_s12  ;;  %s3263_s24 = scalar_lea.hbm %s4566_s0, 512 }
  0x3f   : > { %p3264_p12 = scmp.lt.s32.totalorder %s3257_s10, %s4566_s0  ;;  %p3265_p2 = scmp.lt.s32.totalorder %s3263_s24, %s3258_s12 }
  0x40   : > { %p3261_p10 = pnand %p3260_p9, %p3259_p8 }
  0x41   : > { %p3266_p5 = por %p3265_p2, %p3264_p12 }
  0x42   : > { %p3262_p11 = pneg %p3261_p10 }
  0x44   : > { %p3267_p4 = pnand %p3266_p5, %p3262_p11 }
  0x46   : > { %3270 = shalt.err (!%p3267_p4)
}
  0x47   : > { %s3411_s8 = smov 128   ;;  %s3412_s14 = smov 8  }
  0x48   : > { %2810 = dma.hbm_to_vmem [thread:$0]  (!%p3629_p7), %s533_s27, 4096, %s535_s2, %s523_s6, %s3411_s8, %s3411_s8, %s3412_s14  }
  0x49   : > { %546 = sbr.rel (%p3524_p3) target bundleno = 1071 (0x42f), region = 76 }
  0x4e   : > { %s3646_s22 = sand.u32 1, %s3392_s19  }
  0x4f   : > { %s3649_s1 = sshll.u32 %s3646_s22, 8  ;;  %s549_s10 = scalar_lea.sflag [#allocation3], %s3646_s22 }
  0x50   : > { %s3653_s12 = scalar_lea.vmem [#allocation2], %s3649_s1 }
  0x51   : > { %3359 = dma.done.wait (%p3609_p13), %s549_s10, 4096  }
  0x52   : > { %3361 = vsyncadd (%p3609_p13), %s549_s10, 4294963200 }
  0x53   : > { %3363 = dma.done.wait (%p60_p1), [#allocation6], 1040  }
  0x54   : > { %3365 = vsyncadd (%p60_p1), [#allocation6], 4294966256 }
  0x55   : > { %3367 = dma.done.wait (%p60_p1), [#allocation9], 2048  }
  0x56   : > { %3369 = vsyncadd (%p60_p1), [#allocation9], 4294965248 }
  0x57   : > { %3371 = dma.done.wait (%p60_p1), [#allocation12], 2048  }
  0x58   : > { %3373 = vsyncadd (%p60_p1), [#allocation12], 4294965248 }
  0x59   : > { %3375 = dma.done.wait (%p60_p1), [#allocation15], 1024  }
  0x5a   : > { %3377 = vsyncadd (%p60_p1), [#allocation15], 4294966272  ;;  %v2692_v0 = vld [vmem:[#allocation7 + $0x38] sm:$0xff]  ;;  %v2691_v1 = vld [vmem:[#allocation7 + $0x30] sm:$0xff]  ;;  %s4006_s28 = scalar_lea.vmem [#allocation17], %s3649_s1  ;;  %s4645_s2 = sld [smem:[#allocation51_spill]] }
  0x5b   : > { %796 = vmatpush.bf16.msra.mxu0 %v2692_v0  ;;  %2735 = vmatpush.bf16.msra.mxu2 %v2692_v0  ;;  %v2690_v2 = vld [vmem:[#allocation7 + $0x28] sm:$0xff]  ;;  %v2689_v3 = vld [vmem:[#allocation7 + $0x20] sm:$0xff]  ;;  %v2688_v4 = vld [vmem:[#allocation7 + $0x18] sm:$0xff]  ;;  %s4278_s6 = scalar_lea.vmem [#allocation16], %s3649_s1  ;;  %s4602_s1 = sshll.u32 %s3519_s25, 8 }
  0x5c   : > { %v2687_v5 = vld [vmem:[#allocation7 + $0x10] sm:$0xff]  ;;  %v2686_v6 = vld [vmem:[#allocation7 + $0x8] sm:$0xff]  ;;  %v643_v7 = vld [vmem:[%s3653_s12] sm:$0xff]  ;;  %s4646_s27 = sld [smem:[#allocation53_spill]]  ;;  %s2284_s23 = sshll.u32 %s4006_s28, 4  ;;  %s2285_s23 = int_to_ptr.vmem [resolvable:$true] %s2284_s23 }
  0x5d   : > { %v3676_v8 = vld [vmem:[#allocation5] ss:$0 sm:$0xff]  ;;  %v644_v9 = vld [vmem:[%s3653_s12 + $0x8] sm:$0xff]  ;;  %v645_v19 = vld [vmem:[%s3653_s12 + $0x10] sm:$0xff]  ;;  %s2255_s17 = scalar_lea.sflag [#allocation18], %s3646_s22 }
  0x5e   : > { %v659_v10 = vld [vmem:[%s3653_s12 + $0x80] sm:$0xff]  ;;  %v660_v11 = vld [vmem:[%s3653_s12 + $0x88] sm:$0xff]  ;;  %v3682_v12 = vmul.f32 %v3676_v8, %v643_v7  ;;  %v3685_v13 = vmul.f32 %v3676_v8, %v644_v9  ;;  %v646_v20 = vld [vmem:[%s3653_s12 + $0x18] sm:$0xff]  ;;  %v3708_v23 = vmul.f32 %v3676_v8, %v645_v19 }
  0x5f   : > { %797 = vmatpush.bf16.msra.mxu0 %v2691_v1  ;;  %2736 = vmatpush.bf16.msra.mxu2 %v2691_v1  ;;  %v3688_v14 = vmul.f32 %v3676_v8, %v659_v10  ;;  %v3691_v15 = vmul.f32 %v3676_v8, %v660_v11  ;;  %v2685_v16 = vld [vmem:[#allocation7] sm:$0xff]  ;;  %v661_v21 = vld [vmem:[%s3653_s12 + $0x90] sm:$0xff]  ;;  %v662_v22 = vld [vmem:[%s3653_s12 + $0x98] sm:$0xff]  ;;  %v3711_v24 = vmul.f32 %v3676_v8, %v646_v20 }
  0x60   : > { %v3695_v17 = vpack.c.bf16 %v3685_v13, %v3682_v12  ;;  %v3714_v25 = vmul.f32 %v3676_v8, %v661_v21  ;;  %v3717_v26 = vmul.f32 %v3676_v8, %v662_v22  ;;  %v647_v29 = vld [vmem:[%s3653_s12 + $0x20] sm:$0xff]  ;;  %v648_v30 = vld [vmem:[%s3653_s12 + $0x28] sm:$0xff]  ;;  %v649_v39 = vld [vmem:[%s3653_s12 + $0x30] sm:$0xff] }
  0x61   : > { %v3699_v18 = vpack.c.bf16 %v3691_v15, %v3688_v14  ;;  %v3721_v27 = vpack.c.bf16 %v3711_v24, %v3708_v23  ;;  %v663_v31 = vld [vmem:[%s3653_s12 + $0xa0] sm:$0xff]  ;;  %v664_v32 = vld [vmem:[%s3653_s12 + $0xa8] sm:$0xff]  ;;  %v3734_v33 = vmul.f32 %v3676_v8, %v647_v29  ;;  %v3737_v34 = vmul.f32 %v3676_v8, %v648_v30  ;;  %v650_v40 = vld [vmem:[%s3653_s12 + $0x38] sm:$0xff] }
  0x62   : > { %v3725_v28 = vpack.c.bf16 %v3717_v26, %v3714_v25  ;;  %v3740_v35 = vmul.f32 %v3676_v8, %v663_v31  ;;  %v3743_v36 = vmul.f32 %v3676_v8, %v664_v32  ;;  %v665_v41 = vld [vmem:[%s3653_s12 + $0xb0] sm:$0xff]  ;;  %v666_v42 = vld [vmem:[%s3653_s12 + $0xb8] sm:$0xff]  ;;  %v3760_v43 = vmul.f32 %v3676_v8, %v649_v39  ;;  %v651_v49 = vld [vmem:[%s3653_s12 + $0x40] sm:$0xff]  ;;  %s2283_s4 = scalar_lea.hbm %s4646_s27, %s4602_s1 }
  0x63   : > { %798 = vmatpush.bf16.msra.mxu0 %v2690_v2  ;;  %2737 = vmatpush.bf16.msra.mxu2 %v2690_v2  ;;  %v3747_v37 = vpack.c.bf16 %v3737_v34, %v3734_v33  ;;  %v3763_v44 = vmul.f32 %v3676_v8, %v650_v40  ;;  %v3766_v45 = vmul.f32 %v3676_v8, %v665_v41  ;;  %v652_v50 = vld [vmem:[%s3653_s12 + $0x48] sm:$0xff]  ;;  %v667_v51 = vld [vmem:[%s3653_s12 + $0xc0] sm:$0xff]  ;;  %v653_v60 = vld [vmem:[%s3653_s12 + $0x50] sm:$0xff]  ;;  %s2286_s24 = sshll.u32 %s2283_s4, 4  ;;  %s2287_s24 = int_to_ptr.hbm [resolvable:$true] %s2286_s24 }
  0x64   : > { %4627 = vst [vmem:[#allocation26_spill] sm:$0xff] %v3743_v36  ;;  %v3751_v38 = vpack.c.bf16 %v3743_v36, %v3740_v35  ;;  %v3769_v46 = vmul.f32 %v3676_v8, %v666_v42  ;;  %v668_v52 = vld [vmem:[%s3653_s12 + $0xc8] sm:$0xff]  ;;  %v3786_v53 = vmul.f32 %v3676_v8, %v651_v49  ;;  %v3789_v54 = vmul.f32 %v3676_v8, %v652_v50  ;;  %v2700_v59 = vld [vmem:[#allocation8 + $0x38] sm:$0xff]  ;;  %v669_v62 = vld [vmem:[%s3653_s12 + $0xd0] sm:$0xff]  ;;  %s3300_s8 = sshra.s32 %s2287_s24, 4  ;;  %s3301_s8 = int_to_ptr.hbm [resolvable:$true] %s3300_s8 }
  0x65   : > { %4628 = vst [vmem:[#allocation27_spill] sm:$0xff] %v3766_v45  ;;  %v3773_v47 = vpack.c.bf16 %v3763_v44, %v3760_v43  ;;  %v3792_v55 = vmul.f32 %v3676_v8, %v667_v51  ;;  %v3795_v56 = vmul.f32 %v3676_v8, %v668_v52  ;;  %1001 = vmatpush.bf16.msra.mxu1 %v2700_v59  ;;  %v654_v61 = vld [vmem:[%s3653_s12 + $0x58] sm:$0xff]  ;;  %v2698_v7 = vld [vmem:[#allocation8 + $0x28] sm:$0xff]  ;;  %v655_v9 = vld [vmem:[%s3653_s12 + $0x60] sm:$0xff]  ;;  %s3302_s14 = scalar_lea.hbm %s3301_s8, 256  ;;  %p3307_p13 = scmp.lt.s32.totalorder %s3301_s8, %s4646_s27 }
  0x66   : > { %4629 = vst [vmem:[#allocation28_spill] sm:$0xff] %v3769_v46  ;;  %v3777_v48 = vpack.c.bf16 %v3769_v46, %v3766_v45  ;;  %v3799_v57 = vpack.c.bf16 %v3789_v54, %v3786_v53  ;;  %2743 = vmatpush.bf16.msra.mxu3 %v2700_v59  ;;  %v670_v63 = vld [vmem:[%s3653_s12 + $0xd8] sm:$0xff]  ;;  %v3812_v0 = vmul.f32 %v3676_v8, %v653_v60  ;;  %v656_v10 = vld [vmem:[%s3653_s12 + $0x68] sm:$0xff]  ;;  %v671_v11 = vld [vmem:[%s3653_s12 + $0xe0] sm:$0xff]  ;;  %p3303_p1 = scmp.ne.s32.totalorder %s3301_s8, %s3302_s14 }
  0x67   : > { %799 = vmatpush.bf16.msra.mxu0 %v2689_v3  ;;  %2738 = vmatpush.bf16.msra.mxu2 %v2689_v3  ;;  %4630 = vst [vmem:[#allocation29_spill] sm:$0xff] %v3792_v55  ;;  %v3803_v58 = vpack.c.bf16 %v3795_v56, %v3792_v55  ;;  %v3815_v1 = vmul.f32 %v3676_v8, %v654_v61  ;;  %v2697_v19 = vld [vmem:[#allocation8 + $0x20] sm:$0xff]  ;;  %v2696_v30 = vld [vmem:[#allocation8 + $0x18] sm:$0xff]  ;;  %v2695_v39 = vld [vmem:[#allocation8 + $0x10] sm:$0xff] }
  0x68   : > { %4631 = vst [vmem:[#allocation30_spill] sm:$0xff] %v3795_v56  ;;  %v3818_v2 = vmul.f32 %v3676_v8, %v669_v62  ;;  %v3821_v3 = vmul.f32 %v3676_v8, %v670_v63  ;;  %v3838_v20 = vmul.f32 %v3676_v8, %v655_v9  ;;  %v3841_v21 = vmul.f32 %v3676_v8, %v656_v10  ;;  %v2694_v40 = vld [vmem:[#allocation8 + $0x8] sm:$0xff]  ;;  %v658_v42 = vld [vmem:[%s3653_s12 + $0x78] sm:$0xff]  ;;  %v2693_v51 = vld [vmem:[#allocation8] sm:$0xff]  ;;  %p3304_p3 = pnand %p3303_p1, %p3613_p0 }
  0x69   : > { %v3844_v22 = vmul.f32 %v3676_v8, %v671_v11  ;;  %v657_v41 = vld [vmem:[%s3653_s12 + $0x70] sm:$0xff]  ;;  %v674_v50 = vld [vmem:[%s3653_s12 + $0xf8] sm:$0xff]  ;;  %v3867_v59 = vmul.f32 %v3676_v8, %v658_v42 }
  0x6a   : > { %4632 = vst [vmem:[#allocation31_spill] sm:$0xff] %v3818_v2  ;;  %v3851_v31 = vpack.c.bf16 %v3841_v21, %v3838_v20  ;;  %v673_v49 = vld [vmem:[%s3653_s12 + $0xf0] sm:$0xff]  ;;  %v3864_v52 = vmul.f32 %v3676_v8, %v657_v41  ;;  %v3873_v61 = vmul.f32 %v3676_v8, %v674_v50  ;;  %p3305_p4 = pneg %p3304_p3 }
  0x6b   : > { %800 = vmatpush.bf16.msra.mxu0 %v2688_v4  ;;  %2739 = vmatpush.bf16.msra.mxu2 %v2688_v4  ;;  %4633 = vst [vmem:[#allocation32_spill] sm:$0xff] %v3821_v3  ;;  %v3825_v4 = vpack.c.bf16 %v3815_v1, %v3812_v0  ;;  %v3870_v60 = vmul.f32 %v3676_v8, %v673_v49  ;;  %v2715_v10 = vld [vmem:[#allocation11 + $0x30] sm:$0xff] }
  0x6c   : > { %4634 = vst [vmem:[#allocation33_spill] sm:$0xff] %v3844_v22  ;;  %v3877_v62 = vpack.c.bf16 %v3867_v59, %v3864_v52 }
  0x6d   : > { %4636 = vst [vmem:[#allocation35_spill] sm:$0xff] %v3870_v60  ;;  %v3881_v63 = vpack.c.bf16 %v3873_v61, %v3870_v60 }
  0x6e   : > { %4637 = vst [vmem:[#allocation36_spill] sm:$0xff] %v3873_v61 }
  0x6f   : > { %801 = vmatpush.bf16.msra.mxu0 %v2687_v5  ;;  %2740 = vmatpush.bf16.msra.mxu2 %v2687_v5  ;;  %v3829_v5 = vpack.c.bf16 %v3821_v3, %v3818_v2 }
  0x73   : > { %802 = vmatpush.bf16.msra.mxu0 %v2686_v6  ;;  %2741 = vmatpush.bf16.msra.mxu2 %v2686_v6  ;;  %v2699_v6 = vld [vmem:[#allocation8 + $0x30] sm:$0xff] }
  0x74   : > { %1002 = vmatpush.bf16.msra.mxu1 %v2699_v6  ;;  %2744 = vmatpush.bf16.msra.mxu3 %v2699_v6  ;;  %v2716_v6 = vld [vmem:[#allocation11 + $0x38] sm:$0xff] }
  0x77   : > { %803 = vmatpush.bf16.msra.mxu0 %v2685_v16  ;;  %2742 = vmatpush.bf16.msra.mxu2 %v2685_v16  ;;  %v672_v16 = vld [vmem:[%s3653_s12 + $0xe8] sm:$0xff] }
  0x78   : > { %1003 = vmatpush.bf16.msra.mxu1 %v2698_v7  ;;  %2745 = vmatpush.bf16.msra.mxu3 %v2698_v7  ;;  %v3847_v29 = vmul.f32 %v3676_v8, %v672_v16  ;;  %v3888_v8 = vld [vmem:[%s4569_s3] ss:$0 sm:$0xff] }
  0x7a   : > { %804 = vmatmul.bf16.vlgmr.msra.gmra.mxu0 %v3695_v17  ;;  %844 = vmatmul.bf16.vlgmr.msra.gmra.mxu2 %v3699_v18  ;;  %4635 = vst [vmem:[#allocation34_spill] sm:$0xff] %v3847_v29  ;;  %v3855_v32 = vpack.c.bf16 %v3847_v29, %v3844_v22 }
  0x7c   : > { %1004 = vmatpush.bf16.msra.mxu1 %v2697_v19  ;;  %2746 = vmatpush.bf16.msra.mxu3 %v2697_v19 }
  0x80   : > { %1005 = vmatpush.bf16.msra.mxu1 %v2696_v30  ;;  %2747 = vmatpush.bf16.msra.mxu3 %v2696_v30 }
  0x84   : > { %1006 = vmatpush.bf16.msra.mxu1 %v2695_v39  ;;  %2748 = vmatpush.bf16.msra.mxu3 %v2695_v39 }
  0x88   : > { %1007 = vmatpush.bf16.msra.mxu1 %v2694_v40  ;;  %2749 = vmatpush.bf16.msra.mxu3 %v2694_v40 }
  0x8a   : > { %809 = vmatmul.bf16.gmra.mxu0 %v3721_v27  ;;  %849 = vmatmul.bf16.gmra.mxu2 %v3725_v28 }
  0x8c   : > { %1008 = vmatpush.bf16.msra.mxu1 %v2693_v51  ;;  %2750 = vmatpush.bf16.msra.mxu3 %v2693_v51 }
  0x90   : > { %1430 = vmatpush.bf16.msrb.mxu3 %v2716_v6 }
  0x94   : > { %1431 = vmatpush.bf16.msrb.mxu3 %v2715_v10  ;;  %v2714_v10 = vld [vmem:[#allocation11 + $0x28] sm:$0xff] }
  0x98   : > { %1432 = vmatpush.bf16.msrb.mxu3 %v2714_v10 }
  0x9a   : > { %814 = vmatmul.bf16.gmra.mxu0 %v3747_v37  ;;  %854 = vmatmul.bf16.gmra.mxu2 %v3751_v38 }
  0xaa   : > { %819 = vmatmul.bf16.gmra.mxu0 %v3773_v47  ;;  %859 = vmatmul.bf16.gmra.mxu2 %v3777_v48 }
  0xba   : > { %824 = vmatmul.bf16.gmra.mxu0 %v3799_v57  ;;  %864 = vmatmul.bf16.gmra.mxu2 %v3803_v58 }
  0xca   : > { %829 = vmatmul.bf16.gmra.mxu0 %v3825_v4  ;;  %869 = vmatmul.bf16.gmra.mxu2 %v3829_v5 }
  0xda   : > { %834 = vmatmul.bf16.gmra.mxu0 %v3851_v31  ;;  %874 = vmatmul.bf16.gmra.mxu2 %v3855_v32 }
  0xea   : > { %839 = vmatmul.bf16.gmra.mxu0 %v3877_v62  ;;  %879 = vmatmul.bf16.gmra.mxu2 %v3881_v63 }
  0xf7   : > { %v805_v7 = vpop.f32.mrf.mxu0 }
  0xf8   : > { %v806_v9 = vadd.f32 %v3888_v8, %v805_v7 }
  0xfa   : > { %v885_v19 = vmax.f32 %v806_v9, 0.0 }
  0xfd   : > { %v845_v11 = vpop.f32.mrf.mxu2 }
  0xfe   : > { %v846_v40 = vadd.f32 %v3888_v8, %v845_v11 }
  0xff   : > { %v807_v16 = vpop.f32.mrf.mxu0 }
 0x100   : > { %v808_v30 = vadd.f32 %v3888_v8, %v807_v16  ;;  %v901_v51 = vmax.f32 %v846_v40, 0.0 }
 0x102   : > { %v886_v39 = vmax.f32 %v808_v30, 0.0 }
 0x104   : > { %v917_v41 = vpack.c.bf16 %v886_v39, %v885_v19 }
 0x105   : > { %v847_v42 = vpop.f32.mrf.mxu2 }
 0x106   : > { %v848_v49 = vadd.f32 %v3888_v8, %v847_v42  ;;  %1009 = vmatmul.bf16.vlgmr.msra.gmra.mxu1 %v917_v41 }
 0x107   : > { %v810_v50 = vpop.f32.mrf.mxu0 }
 0x108   : > { %v902_v6 = vmax.f32 %v848_v49, 0.0  ;;  %v811_v7 = vadd.f32 %v3888_v8, %v810_v50 }
 0x10a   : > { %v925_v61 = vpack.c.bf16 %v902_v6, %v901_v51  ;;  %v887_v16 = vmax.f32 %v811_v7, 0.0  ;;  %v2713_v6 = vld [vmem:[#allocation11 + $0x20] sm:$0xff] }
 0x10b   : > { %1433 = vmatpush.bf16.msrb.mxu3 %v2713_v6 }
 0x10c   : > { %1049 = vmatmul.bf16.vlgmr.msra.gmra.mxu3 %v925_v61 }
 0x10d   : > { %v850_v60 = vpop.f32.mrf.mxu2 }
 0x10e   : > { %v851_v19 = vadd.f32 %v3888_v8, %v850_v60 }
 0x10f   : > { %v812_v9 = vpop.f32.mrf.mxu0 }
 0x110   : > { %v813_v30 = vadd.f32 %v3888_v8, %v812_v9  ;;  %v903_v49 = vmax.f32 %v851_v19, 0.0 }
 0x112   : > { %v888_v11 = vmax.f32 %v813_v30, 0.0 }
 0x114   : > { %v918_v39 = vpack.c.bf16 %v888_v11, %v887_v16 }
 0x115   : > { %v852_v42 = vpop.f32.mrf.mxu2 }
 0x116   : > { %v853_v41 = vadd.f32 %v3888_v8, %v852_v42  ;;  %1014 = vmatmul.bf16.gmra.mxu1 %v918_v39 }
 0x117   : > { %v815_v40 = vpop.f32.mrf.mxu0 }
 0x118   : > { %v904_v51 = vmax.f32 %v853_v41, 0.0  ;;  %v816_v61 = vadd.f32 %v3888_v8, %v815_v40 }
 0x11a   : > { %v926_v50 = vpack.c.bf16 %v904_v51, %v903_v49  ;;  %v889_v9 = vmax.f32 %v816_v61, 0.0 }
 0x11c   : > { %1054 = vmatmul.bf16.gmra.mxu3 %v926_v50  ;;  %v2712_v50 = vld [vmem:[#allocation11 + $0x18] sm:$0xff] }
 0x11d   : > { %v855_v10 = vpop.f32.mrf.mxu2  ;;  %1434 = vmatpush.bf16.msrb.mxu3 %v2712_v50 }
 0x11e   : > { %v856_v16 = vadd.f32 %v3888_v8, %v855_v10 }
 0x11f   : > { %v817_v7 = vpop.f32.mrf.mxu0 }
 0x120   : > { %v818_v30 = vadd.f32 %v3888_v8, %v817_v7  ;;  %v905_v41 = vmax.f32 %v856_v16, 0.0 }
 0x122   : > { %v890_v60 = vmax.f32 %v818_v30, 0.0 }
 0x124   : > { %v919_v11 = vpack.c.bf16 %v890_v60, %v889_v9 }
 0x125   : > { %v857_v42 = vpop.f32.mrf.mxu2 }
 0x126   : > { %v858_v39 = vadd.f32 %v3888_v8, %v857_v42  ;;  %1019 = vmatmul.bf16.gmra.mxu1 %v919_v11 }
 0x127   : > { %v820_v19 = vpop.f32.mrf.mxu0 }
 0x128   : > { %v906_v49 = vmax.f32 %v858_v39, 0.0  ;;  %v821_v51 = vadd.f32 %v3888_v8, %v820_v19 }
 0x12a   : > { %v927_v40 = vpack.c.bf16 %v906_v49, %v905_v41  ;;  %v891_v7 = vmax.f32 %v821_v51, 0.0 }
 0x12c   : > { %1059 = vmatmul.bf16.gmra.mxu3 %v927_v40  ;;  %v2711_v40 = vld [vmem:[#allocation11 + $0x10] sm:$0xff] }
 0x12d   : > { %v860_v6 = vpop.f32.mrf.mxu2  ;;  %1435 = vmatpush.bf16.msrb.mxu3 %v2711_v40 }
 0x12e   : > { %v861_v9 = vadd.f32 %v3888_v8, %v860_v6 }
 0x12f   : > { %v822_v61 = vpop.f32.mrf.mxu0 }
 0x130   : > { %v823_v30 = vadd.f32 %v3888_v8, %v822_v61  ;;  %v907_v39 = vmax.f32 %v861_v9, 0.0 }
 0x132   : > { %v892_v10 = vmax.f32 %v823_v30, 0.0 }
 0x134   : > { %v920_v60 = vpack.c.bf16 %v892_v10, %v891_v7 }
 0x135   : > { %v862_v42 = vpop.f32.mrf.mxu2 }
 0x136   : > { %v863_v11 = vadd.f32 %v3888_v8, %v862_v42  ;;  %1024 = vmatmul.bf16.gmra.mxu1 %v920_v60 }
 0x137   : > { %v825_v16 = vpop.f32.mrf.mxu0 }
 0x138   : > { %v908_v41 = vmax.f32 %v863_v11, 0.0  ;;  %v826_v49 = vadd.f32 %v3888_v8, %v825_v16 }
 0x13a   : > { %v928_v19 = vpack.c.bf16 %v908_v41, %v907_v39  ;;  %v893_v61 = vmax.f32 %v826_v49, 0.0 }
 0x13c   : > { %1064 = vmatmul.bf16.gmra.mxu3 %v928_v19  ;;  %v2710_v19 = vld [vmem:[#allocation11 + $0x8] sm:$0xff] }
 0x13d   : > { %v865_v50 = vpop.f32.mrf.mxu2  ;;  %1436 = vmatpush.bf16.msrb.mxu3 %v2710_v19 }
 0x13e   : > { %v866_v7 = vadd.f32 %v3888_v8, %v865_v50  ;;  %v2708_v50 = vld [vmem:[#allocation10 + $0x38] sm:$0xff] }
 0x13f   : > { %v827_v51 = vpop.f32.mrf.mxu0  ;;  %1206 = vmatpush.bf16.msrb.mxu2 %v2708_v50 }
 0x140   : > { %v828_v30 = vadd.f32 %v3888_v8, %v827_v51  ;;  %v909_v11 = vmax.f32 %v866_v7, 0.0  ;;  %v2707_v7 = vld [vmem:[#allocation10 + $0x30] sm:$0xff] }
 0x142   : > { %v894_v6 = vmax.f32 %v828_v30, 0.0 }
 0x143   : > { %1207 = vmatpush.bf16.msrb.mxu2 %v2707_v7 }
 0x144   : > { %v921_v10 = vpack.c.bf16 %v894_v6, %v893_v61 }
 0x145   : > { %v867_v42 = vpop.f32.mrf.mxu2 }
 0x146   : > { %v868_v60 = vadd.f32 %v3888_v8, %v867_v42  ;;  %1029 = vmatmul.bf16.gmra.mxu1 %v921_v10 }
 0x147   : > { %v830_v9 = vpop.f32.mrf.mxu0 }
 0x148   : > { %v910_v39 = vmax.f32 %v868_v60, 0.0  ;;  %v831_v41 = vadd.f32 %v3888_v8, %v830_v9 }
 0x14a   : > { %v929_v16 = vpack.c.bf16 %v910_v39, %v909_v11  ;;  %v895_v51 = vmax.f32 %v831_v41, 0.0 }
 0x14c   : > { %1069 = vmatmul.bf16.gmra.mxu3 %v929_v16  ;;  %v2706_v16 = vld [vmem:[#allocation10 + $0x28] sm:$0xff] }
 0x14d   : > { %v870_v40 = vpop.f32.mrf.mxu2  ;;  %1208 = vmatpush.bf16.msrb.mxu2 %v2706_v16 }
 0x14e   : > { %v871_v6 = vadd.f32 %v3888_v8, %v870_v40 }
 0x14f   : > { %v832_v49 = vpop.f32.mrf.mxu0 }
 0x150   : > { %v833_v30 = vadd.f32 %v3888_v8, %v832_v49  ;;  %v911_v11 = vmax.f32 %v871_v6, 0.0  ;;  %v2709_v49 = vld [vmem:[#allocation11] sm:$0xff] }
 0x151   : > { %1437 = vmatpush.bf16.msrb.mxu3 %v2709_v49  ;;  %v2702_v49 = vld [vmem:[#allocation10 + $0x8] sm:$0xff] }
 0x152   : > { %v896_v61 = vmax.f32 %v833_v30, 0.0  ;;  %v2705_v30 = vld [vmem:[#allocation10 + $0x20] sm:$0xff] }
 0x153   : > { %1209 = vmatpush.bf16.msrb.mxu2 %v2705_v30 }
 0x154   : > { %v922_v10 = vpack.c.bf16 %v896_v61, %v895_v51 }
 0x155   : > { %v872_v42 = vpop.f32.mrf.mxu2 }
 0x156   : > { %v873_v60 = vadd.f32 %v3888_v8, %v872_v42  ;;  %1034 = vmatmul.bf16.gmra.mxu1 %v922_v10  ;;  %v2704_v10 = vld [vmem:[#allocation10 + $0x18] sm:$0xff] }
 0x157   : > { %v835_v9 = vpop.f32.mrf.mxu0  ;;  %1210 = vmatpush.bf16.msrb.mxu2 %v2704_v10 }
 0x158   : > { %v912_v39 = vmax.f32 %v873_v60, 0.0  ;;  %v836_v41 = vadd.f32 %v3888_v8, %v835_v9 }
 0x15a   : > { %v930_v19 = vpack.c.bf16 %v912_v39, %v911_v11  ;;  %v897_v51 = vmax.f32 %v836_v41, 0.0  ;;  %v2703_v11 = vld [vmem:[#allocation10 + $0x10] sm:$0xff] }
 0x15b   : > { %1211 = vmatpush.bf16.msrb.mxu2 %v2703_v11 }
 0x15c   : > { %1074 = vmatmul.bf16.gmra.mxu3 %v930_v19 }
 0x15d   : > { %v875_v50 = vpop.f32.mrf.mxu2 }
 0x15e   : > { %v876_v6 = vadd.f32 %v3888_v8, %v875_v50 }
 0x15f   : > { %v837_v40 = vpop.f32.mrf.mxu0  ;;  %1212 = vmatpush.bf16.msrb.mxu2 %v2702_v49 }
 0x160   : > { %v838_v61 = vadd.f32 %v3888_v8, %v837_v40  ;;  %v913_v16 = vmax.f32 %v876_v6, 0.0 }
 0x162   : > { %v898_v42 = vmax.f32 %v838_v61, 0.0  ;;  %v2701_v61 = vld [vmem:[#allocation10] sm:$0xff] }
 0x163   : > { %1213 = vmatpush.bf16.msrb.mxu2 %v2701_v61 }
 0x164   : > { %v923_v7 = vpack.c.bf16 %v898_v42, %v897_v51 }
 0x165   : > { %v877_v60 = vpop.f32.mrf.mxu2 }
 0x166   : > { %v878_v9 = vadd.f32 %v3888_v8, %v877_v60  ;;  %1039 = vmatmul.bf16.gmra.mxu1 %v923_v7 }
 0x167   : > { %v840_v39 = vpop.f32.mrf.mxu0 }
 0x168   : > { %v914_v19 = vmax.f32 %v878_v9, 0.0  ;;  %v841_v41 = vadd.f32 %v3888_v8, %v840_v39  ;;  %v2724_v39 = vld [vmem:[#allocation13 + $0x38] sm:$0xff] }
 0x169   : > { %1635 = vmatpush.bf16.msrb.mxu0 %v2724_v39 }
 0x16a   : > { %v931_v30 = vpack.c.bf16 %v914_v19, %v913_v16  ;;  %v899_v50 = vmax.f32 %v841_v41, 0.0 }
 0x16c   : > { %1079 = vmatmul.bf16.gmra.mxu3 %v931_v30  ;;  %v3925_v30 = vld [vmem:[%s4571_s5] ss:$0 sm:$0xff] }
 0x16d   : > { %v880_v40 = vpop.f32.mrf.mxu2 }
 0x16e   : > { %v881_v7 = vadd.f32 %v3888_v8, %v880_v40 }
 0x16f   : > { %v842_v10 = vpop.f32.mrf.mxu0 }
 0x170   : > { %v843_v51 = vadd.f32 %v3888_v8, %v842_v10  ;;  %v915_v9 = vmax.f32 %v881_v7, 0.0 }
 0x172   : > { %v900_v42 = vmax.f32 %v843_v51, 0.0 }
 0x174   : > { %v924_v60 = vpack.c.bf16 %v900_v42, %v899_v50  ;;  %v2723_v50 = vld [vmem:[#allocation13 + $0x30] sm:$0xff] }
 0x175   : > { %v882_v11 = vpop.f32.mrf.mxu2  ;;  %1636 = vmatpush.bf16.msrb.mxu0 %v2723_v50 }
 0x176   : > { %v883_v6 = vadd.f32 %v3888_v8, %v882_v11  ;;  %1044 = vmatmul.bf16.gmra.mxu1 %v924_v60 }
 0x178   : > { %v916_v16 = vmax.f32 %v883_v6, 0.0 }
 0x17a   : > { %v932_v19 = vpack.c.bf16 %v916_v16, %v915_v9 }
 0x17c   : > { %1084 = vmatmul.bf16.gmra.mxu3 %v932_v19 }
 0x183   : > { %v1010_v49 = vpop.f32.mrf.mxu1 }
 0x184   : > { %v1011_v41 = vadd.f32 %v3925_v30, %v1010_v49 }
 0x186   : > { %v1090_v61 = vmax.f32 %v1011_v41, 0.0 }
 0x18b   : > { %v1012_v40 = vpop.f32.mrf.mxu1 }
 0x18c   : > { %v1013_v10 = vadd.f32 %v3925_v30, %v1012_v40  ;;  %1438 = vmatmul.bf16.vlgmr.msrb.gmra.mxu3 %v3695_v17 }
 0x18e   : > { %v1091_v8 = vmax.f32 %v1013_v10, 0.0 }
 0x18f   : > { %v1050_v51 = vpop.f32.mrf.mxu3 }
 0x190   : > { %v1122_v42 = vpack.c.bf16 %v1091_v8, %v1090_v61  ;;  %v1051_v60 = vadd.f32 %v3925_v30, %v1050_v51  ;;  %v2722_v61 = vld [vmem:[#allocation13 + $0x28] sm:$0xff] }
 0x191   : > { %1637 = vmatpush.bf16.msrb.mxu0 %v2722_v61 }
 0x192   : > { %1214 = vmatmul.bf16.vlgmr.msrb.gmra.mxu2 %v1122_v42  ;;  %v1106_v16 = vmax.f32 %v1051_v60, 0.0 }
 0x193   : > { %v1015_v7 = vpop.f32.mrf.mxu1 }
 0x194   : > { %v1016_v6 = vadd.f32 %v3925_v30, %v1015_v7 }
 0x196   : > { %v1092_v49 = vmax.f32 %v1016_v6, 0.0 }
 0x197   : > { %v1052_v11 = vpop.f32.mrf.mxu3 }
 0x198   : > { %v1053_v9 = vadd.f32 %v3925_v30, %v1052_v11 }
 0x19a   : > { %v1107_v19 = vmax.f32 %v1053_v9, 0.0 }
 0x19b   : > { %v1017_v39 = vpop.f32.mrf.mxu1 }
 0x19c   : > { %v1018_v17 = vadd.f32 %v3925_v30, %v1017_v39  ;;  %1443 = vmatmul.bf16.gmra.mxu3 %v3721_v27  ;;  %v3935_v41 = vpack.c.bf16 %v1107_v19, %v1106_v16 }
 0x19e   : > { %v1093_v40 = vmax.f32 %v1018_v17, 0.0 }
 0x19f   : > { %v1055_v10 = vpop.f32.mrf.mxu3 }
 0x1a0   : > { %v1123_v8 = vpack.c.bf16 %v1093_v40, %v1092_v49  ;;  %v1056_v51 = vadd.f32 %v3925_v30, %v1055_v10  ;;  %v2721_v49 = vld [vmem:[#allocation13 + $0x20] sm:$0xff] }
 0x1a1   : > { %1638 = vmatpush.bf16.msrb.mxu0 %v2721_v49 }
 0x1a2   : > { %1219 = vmatmul.bf16.gmra.mxu2 %v1123_v8  ;;  %v1108_v11 = vmax.f32 %v1056_v51, 0.0 }
 0x1a3   : > { %v1020_v50 = vpop.f32.mrf.mxu1 }
 0x1a4   : > { %v1021_v7 = vadd.f32 %v3925_v30, %v1020_v50 }
 0x1a6   : > { %v1094_v27 = vmax.f32 %v1021_v7, 0.0 }
 0x1a7   : > { %v1057_v42 = vpop.f32.mrf.mxu3 }
 0x1a8   : > { %v1058_v60 = vadd.f32 %v3925_v30, %v1057_v42 }
 0x1aa   : > { %v1109_v6 = vmax.f32 %v1058_v60, 0.0 }
 0x1ab   : > { %v1022_v9 = vpop.f32.mrf.mxu1 }
 0x1ac   : > { %v1023_v16 = vadd.f32 %v3925_v30, %v1022_v9  ;;  %1448 = vmatmul.bf16.gmra.mxu3 %v3747_v37  ;;  %v3942_v19 = vpack.c.bf16 %v1109_v6, %v1108_v11 }
 0x1ae   : > { %v1095_v39 = vmax.f32 %v1023_v16, 0.0 }
 0x1af   : > { %v1060_v17 = vpop.f32.mrf.mxu3 }
 0x1b0   : > { %v1124_v40 = vpack.c.bf16 %v1095_v39, %v1094_v27  ;;  %v1061_v10 = vadd.f32 %v3925_v30, %v1060_v17  ;;  %v2720_v27 = vld [vmem:[#allocation13 + $0x18] sm:$0xff] }
 0x1b1   : > { %1639 = vmatpush.bf16.msrb.mxu0 %v2720_v27 }
 0x1b2   : > { %1224 = vmatmul.bf16.gmra.mxu2 %v1124_v40  ;;  %v1110_v42 = vmax.f32 %v1061_v10, 0.0 }
 0x1b3   : > { %v1025_v61 = vpop.f32.mrf.mxu1 }
 0x1b4   : > { %v1026_v50 = vadd.f32 %v3925_v30, %v1025_v61 }
 0x1b6   : > { %v1096_v37 = vmax.f32 %v1026_v50, 0.0 }
 0x1b7   : > { %v1062_v8 = vpop.f32.mrf.mxu3 }
 0x1b8   : > { %v1063_v51 = vadd.f32 %v3925_v30, %v1062_v8 }
 0x1ba   : > { %v1111_v7 = vmax.f32 %v1063_v51, 0.0 }
 0x1bb   : > { %v1027_v60 = vpop.f32.mrf.mxu1 }
 0x1bc   : > { %v1028_v11 = vadd.f32 %v3925_v30, %v1027_v60  ;;  %1453 = vmatmul.bf16.gmra.mxu3 %v3773_v47  ;;  %v3949_v6 = vpack.c.bf16 %v1111_v7, %v1110_v42 }
 0x1be   : > { %v1097_v9 = vmax.f32 %v1028_v11, 0.0 }
 0x1bf   : > { %v1065_v16 = vpop.f32.mrf.mxu3 }
 0x1c0   : > { %v1125_v39 = vpack.c.bf16 %v1097_v9, %v1096_v37  ;;  %v1066_v17 = vadd.f32 %v3925_v30, %v1065_v16  ;;  %v2719_v37 = vld [vmem:[#allocation13 + $0x10] sm:$0xff] }
 0x1c1   : > { %1640 = vmatpush.bf16.msrb.mxu0 %v2719_v37 }
 0x1c2   : > { %1229 = vmatmul.bf16.gmra.mxu2 %v1125_v39  ;;  %v1112_v8 = vmax.f32 %v1066_v17, 0.0 }
 0x1c3   : > { %v1030_v49 = vpop.f32.mrf.mxu1 }
 0x1c4   : > { %v1031_v61 = vadd.f32 %v3925_v30, %v1030_v49 }
 0x1c6   : > { %v1098_v47 = vmax.f32 %v1031_v61, 0.0 }
 0x1c7   : > { %v1067_v40 = vpop.f32.mrf.mxu3 }
 0x1c8   : > { %v1068_v10 = vadd.f32 %v3925_v30, %v1067_v40 }
 0x1ca   : > { %v1113_v50 = vmax.f32 %v1068_v10, 0.0 }
 0x1cb   : > { %v1032_v51 = vpop.f32.mrf.mxu1 }
 0x1cc   : > { %v1033_v42 = vadd.f32 %v3925_v30, %v1032_v51  ;;  %1458 = vmatmul.bf16.gmra.mxu3 %v3799_v57  ;;  %v3956_v7 = vpack.c.bf16 %v1113_v50, %v1112_v8 }
 0x1ce   : > { %v1099_v60 = vmax.f32 %v1033_v42, 0.0 }
 0x1cf   : > { %v1070_v11 = vpop.f32.mrf.mxu3 }
 0x1d0   : > { %v1126_v9 = vpack.c.bf16 %v1099_v60, %v1098_v47  ;;  %v1071_v16 = vadd.f32 %v3925_v30, %v1070_v11  ;;  %v2718_v47 = vld [vmem:[#allocation13 + $0x8] sm:$0xff] }
 0x1d1   : > { %1641 = vmatpush.bf16.msrb.mxu0 %v2718_v47 }
 0x1d2   : > { %1234 = vmatmul.bf16.gmra.mxu2 %v1126_v9  ;;  %v1114_v40 = vmax.f32 %v1071_v16, 0.0 }
 0x1d3   : > { %v1035_v27 = vpop.f32.mrf.mxu1 }
 0x1d4   : > { %v1036_v49 = vadd.f32 %v3925_v30, %v1035_v27 }
 0x1d6   : > { %v1100_v57 = vmax.f32 %v1036_v49, 0.0 }
 0x1d7   : > { %v1072_v39 = vpop.f32.mrf.mxu3 }
 0x1d8   : > { %v1073_v17 = vadd.f32 %v3925_v30, %v1072_v39 }
 0x1da   : > { %v1115_v61 = vmax.f32 %v1073_v17, 0.0 }
 0x1db   : > { %v1037_v10 = vpop.f32.mrf.mxu1 }
 0x1dc   : > { %v1038_v8 = vadd.f32 %v3925_v30, %v1037_v10  ;;  %1463 = vmatmul.bf16.gmra.mxu3 %v3825_v4  ;;  %v3963_v50 = vpack.c.bf16 %v1115_v61, %v1114_v40  ;;  %v2717_v61 = vld [vmem:[#allocation13] sm:$0xff] }
 0x1dd   : > { %1642 = vmatpush.bf16.msrb.mxu0 %v2717_v61 }
 0x1de   : > { %v1101_v51 = vmax.f32 %v1038_v8, 0.0 }
 0x1df   : > { %v1075_v42 = vpop.f32.mrf.mxu3 }
 0x1e0   : > { %v1127_v60 = vpack.c.bf16 %v1101_v51, %v1100_v57  ;;  %v1076_v11 = vadd.f32 %v3925_v30, %v1075_v42 }
 0x1e2   : > { %1239 = vmatmul.bf16.gmra.mxu2 %v1127_v60  ;;  %v1116_v39 = vmax.f32 %v1076_v11, 0.0 }
 0x1e3   : > { %v1040_v37 = vpop.f32.mrf.mxu1 }
 0x1e4   : > { %v1041_v27 = vadd.f32 %v3925_v30, %v1040_v37 }
 0x1e6   : > { %v1102_v4 = vmax.f32 %v1041_v27, 0.0 }
 0x1e7   : > { %v1077_v9 = vpop.f32.mrf.mxu3 }
 0x1e8   : > { %v1078_v16 = vadd.f32 %v3925_v30, %v1077_v9 }
 0x1ea   : > { %v1117_v49 = vmax.f32 %v1078_v16, 0.0 }
 0x1eb   : > { %v1042_v17 = vpop.f32.mrf.mxu1 }
 0x1ec   : > { %v1043_v40 = vadd.f32 %v3925_v30, %v1042_v17  ;;  %1468 = vmatmul.bf16.gmra.mxu3 %v3851_v31  ;;  %v3970_v10 = vpack.c.bf16 %v1117_v49, %v1116_v39 }
 0x1ee   : > { %v1103_v57 = vmax.f32 %v1043_v40, 0.0 }
 0x1ef   : > { %v1080_v8 = vpop.f32.mrf.mxu3 }
 0x1f0   : > { %v1128_v51 = vpack.c.bf16 %v1103_v57, %v1102_v4  ;;  %v1081_v42 = vadd.f32 %v3925_v30, %v1080_v8 }
 0x1f2   : > { %1244 = vmatmul.bf16.gmra.mxu2 %v1128_v51  ;;  %v1118_v9 = vmax.f32 %v1081_v42, 0.0 }
 0x1f3   : > { %v1045_v47 = vpop.f32.mrf.mxu1 }
 0x1f4   : > { %v1046_v37 = vadd.f32 %v3925_v30, %v1045_v47 }
 0x1f6   : > { %v1104_v31 = vmax.f32 %v1046_v37, 0.0  ;;  %v3993_v37 = vld [vmem:[%s4573_s7] ss:$0 sm:$0xff] }
 0x1f7   : > { %v1082_v60 = vpop.f32.mrf.mxu3 }
 0x1f8   : > { %v1083_v11 = vadd.f32 %v3925_v30, %v1082_v60 }
 0x1fa   : > { %v1119_v27 = vmax.f32 %v1083_v11, 0.0  ;;  %v2732_v11 = vld [vmem:[#allocation14 + $0x38] sm:$0xff] }
 0x1fb   : > { %v1047_v16 = vpop.f32.mrf.mxu1  ;;  %1840 = vmatpush.bf16.msrb.mxu1 %v2732_v11 }
 0x1fc   : > { %v1048_v39 = vadd.f32 %v3925_v30, %v1047_v16  ;;  %1473 = vmatmul.bf16.gmra.mxu3 %v3877_v62  ;;  %v3977_v49 = vpack.c.bf16 %v1119_v27, %v1118_v9  ;;  %v3987_v62 = vld [vmem:[%s4575_s9] ss:$0 sm:$0xff] }
 0x1fd   : > { %v675_v9 = vld [vmem:[#allocation5] sm:$0x1] }
 0x1fe   : > { %v1105_v17 = vmax.f32 %v1048_v39, 0.0  ;;  %v676_v39 = vsub.f32 1.0, %v675_v9 }
 0x1ff   : > { %v1085_v4 = vpop.f32.mrf.mxu3 }
 0x200   : > { %v1129_v40 = vpack.c.bf16 %v1105_v17, %v1104_v31  ;;  %v1086_v61 = vadd.f32 %v3925_v30, %v1085_v4 }
 0x202   : > { %1249 = vmatmul.bf16.gmra.mxu2 %v1129_v40  ;;  %v1120_v51 = vmax.f32 %v1086_v61, 0.0  ;;  %v3999_v40 = vperm.slane %v676_v39, 0 }
 0x207   : > { %v1087_v57 = vpop.f32.mrf.mxu3 }
 0x208   : > { %v1088_v8 = vadd.f32 %v3925_v30, %v1087_v57 }
 0x20a   : > { %v1121_v47 = vmax.f32 %v1088_v8, 0.0 }
 0x20c   : > { %1478 = vmatmul.bf16.gmra.mxu3 %v3699_v18  ;;  %v3982_v42 = vpack.c.bf16 %v1121_v47, %v1120_v51 }
 0x20f   : > { %v1439_v60 = vpop.f32.mrf.mxu3 }
 0x210   : > { %v1440_v18 = vadd.f32 %v3987_v62, %v1439_v60  ;;  %v2731_v60 = vld [vmem:[#allocation14 + $0x30] sm:$0xff] }
 0x211   : > { %1841 = vmatpush.bf16.msrb.mxu1 %v2731_v60 }
 0x212   : > { %1254 = vmatmul.bf16.gmra.mxu2 %v3935_v41  ;;  %v1519_v41 = vmax.f32 %v1440_v18, 0.0 }
 0x215   : > { %v1215_v30 = vpop.f32.mrf.mxu2 }
 0x216   : > { %v1216_v27 = vadd.f32 %v3993_v37, %v1215_v30 }
 0x217   : > { %v1441_v16 = vpop.f32.mrf.mxu3 }
 0x218   : > { %2886 = vtanh.f32 %v1216_v27  ;;  %v1442_v31 = vadd.f32 %v3987_v62, %v1441_v16 }
 0x21a   : > { %v1520_v17 = vmax.f32 %v1442_v31, 0.0 }
 0x21c   : > { %1483 = vmatmul.bf16.gmra.mxu3 %v3725_v28  ;;  %v1551_v4 = vpack.c.bf16 %v1520_v17, %v1519_v41 }
 0x21d   : > { %v1217_v61 = vpop.f32.mrf.mxu2 }
 0x21e   : > { %v2887_v57 = vpop.eup %2886  ;;  %v1218_v8 = vadd.f32 %v3993_v37, %v1217_v61  ;;  %1643 = vmatmul.bf16.vlgmr.msrb.gmra.mxu0 %v1551_v4 }
 0x21f   : > { %v4003_v51 = vmul.f32 %v2887_v57, %v3999_v40  ;;  %v1444_v47 = vpop.f32.mrf.mxu3 }
 0x220   : > { %2888 = vtanh.f32 %v1218_v8  ;;  %v1445_v11 = vadd.f32 %v3987_v62, %v1444_v47  ;;  %v2730_v47 = vld [vmem:[#allocation14 + $0x28] sm:$0xff] }
 0x221   : > { %2217 = vst [vmem:[%s4006_s28] sm:$0xff] %v4003_v51  ;;  %1842 = vmatpush.bf16.msrb.mxu1 %v2730_v47 }
 0x222   : > { %1259 = vmatmul.bf16.gmra.mxu2 %v3942_v19  ;;  %v1521_v31 = vmax.f32 %v1445_v11, 0.0 }
 0x225   : > { %v1220_v28 = vpop.f32.mrf.mxu2 }
 0x226   : > { %v2889_v30 = vpop.eup %2888  ;;  %v1221_v9 = vadd.f32 %v3993_v37, %v1220_v28 }
 0x227   : > { %v4014_v18 = vmul.f32 %v2889_v30, %v3999_v40  ;;  %v1446_v27 = vpop.f32.mrf.mxu3 }
 0x228   : > { %2890 = vtanh.f32 %v1221_v9  ;;  %v1447_v16 = vadd.f32 %v3987_v62, %v1446_v27 }
 0x229   : > { %2218 = vst [vmem:[%s4006_s28 + $0x8] sm:$0xff] %v4014_v18 }
 0x22a   : > { %v1522_v19 = vmax.f32 %v1447_v16, 0.0 }
 0x22c   : > { %1488 = vmatmul.bf16.gmra.mxu3 %v3751_v38  ;;  %v1552_v39 = vpack.c.bf16 %v1522_v19, %v1521_v31 }
 0x22d   : > { %v1222_v41 = vpop.f32.mrf.mxu2 }
 0x22e   : > { %v2891_v17 = vpop.eup %2890  ;;  %v1223_v4 = vadd.f32 %v3993_v37, %v1222_v41  ;;  %1648 = vmatmul.bf16.gmra.mxu0 %v1552_v39 }
 0x22f   : > { %v4022_v61 = vmul.f32 %v2891_v17, %v3999_v40  ;;  %v1449_v57 = vpop.f32.mrf.mxu3 }
 0x230   : > { %2892 = vtanh.f32 %v1223_v4  ;;  %v1450_v38 = vadd.f32 %v3987_v62, %v1449_v57  ;;  %v2729_v57 = vld [vmem:[#allocation14 + $0x20] sm:$0xff] }
 0x231   : > { %2219 = vst [vmem:[%s4006_s28 + $0x10] sm:$0xff] %v4022_v61  ;;  %1843 = vmatpush.bf16.msrb.mxu1 %v2729_v57 }
 0x232   : > { %1264 = vmatmul.bf16.gmra.mxu2 %v3949_v6  ;;  %v1523_v27 = vmax.f32 %v1450_v38, 0.0 }
 0x235   : > { %v1225_v8 = vpop.f32.mrf.mxu2 }
 0x236   : > { %v2893_v28 = vpop.eup %2892  ;;  %v1226_v60 = vadd.f32 %v3993_v37, %v1225_v8 }
 0x237   : > { %v4030_v30 = vmul.f32 %v2893_v28, %v3999_v40  ;;  %v1451_v11 = vpop.f32.mrf.mxu3 }
 0x238   : > { %2894 = vtanh.f32 %v1226_v60  ;;  %v1452_v9 = vadd.f32 %v3987_v62, %v1451_v11 }
 0x239   : > { %2220 = vst [vmem:[%s4006_s28 + $0x18] sm:$0xff] %v4030_v30 }
 0x23a   : > { %v1524_v6 = vmax.f32 %v1452_v9, 0.0 }
 0x23c   : > { %1493 = vmatmul.bf16.gmra.mxu3 %v3777_v48  ;;  %v1553_v16 = vpack.c.bf16 %v1524_v6, %v1523_v27 }
 0x23d   : > { %v1227_v31 = vpop.f32.mrf.mxu2 }
 0x23e   : > { %v2895_v19 = vpop.eup %2894  ;;  %v1228_v39 = vadd.f32 %v3993_v37, %v1227_v31  ;;  %1653 = vmatmul.bf16.gmra.mxu0 %v1553_v16 }
 0x23f   : > { %v4038_v41 = vmul.f32 %v2895_v19, %v3999_v40  ;;  %v1454_v17 = vpop.f32.mrf.mxu3 }
 0x240   : > { %2896 = vtanh.f32 %v1228_v39  ;;  %v1455_v48 = vadd.f32 %v3987_v62, %v1454_v17  ;;  %v2728_v17 = vld [vmem:[#allocation14 + $0x18] sm:$0xff] }
 0x241   : > { %2221 = vst [vmem:[%s4006_s28 + $0x20] sm:$0xff] %v4038_v41  ;;  %1844 = vmatpush.bf16.msrb.mxu1 %v2728_v17 }
 0x242   : > { %1269 = vmatmul.bf16.gmra.mxu2 %v3956_v7  ;;  %v1525_v11 = vmax.f32 %v1455_v48, 0.0 }
 0x245   : > { %v1230_v4 = vpop.f32.mrf.mxu2 }
 0x246   : > { %v2897_v8 = vpop.eup %2896  ;;  %v1231_v47 = vadd.f32 %v3993_v37, %v1230_v4 }
 0x247   : > { %v4046_v28 = vmul.f32 %v2897_v8, %v3999_v40  ;;  %v1456_v38 = vpop.f32.mrf.mxu3 }
 0x248   : > { %2898 = vtanh.f32 %v1231_v47  ;;  %v1457_v60 = vadd.f32 %v3987_v62, %v1456_v38 }
 0x249   : > { %2222 = vst [vmem:[%s4006_s28 + $0x28] sm:$0xff] %v4046_v28 }
 0x24a   : > { %v1526_v7 = vmax.f32 %v1457_v60, 0.0 }
 0x24c   : > { %1498 = vmatmul.bf16.gmra.mxu3 %v3803_v58  ;;  %v1554_v9 = vpack.c.bf16 %v1526_v7, %v1525_v11 }
 0x24d   : > { %v1232_v27 = vpop.f32.mrf.mxu2 }
 0x24e   : > { %v2899_v6 = vpop.eup %2898  ;;  %v1233_v16 = vadd.f32 %v3993_v37, %v1232_v27  ;;  %1658 = vmatmul.bf16.gmra.mxu0 %v1554_v9 }
 0x24f   : > { %v4054_v31 = vmul.f32 %v2899_v6, %v3999_v40  ;;  %v1459_v19 = vpop.f32.mrf.mxu3 }
 0x250   : > { %2900 = vtanh.f32 %v1233_v16  ;;  %v1460_v58 = vadd.f32 %v3987_v62, %v1459_v19  ;;  %v2727_v19 = vld [vmem:[#allocation14 + $0x10] sm:$0xff] }
 0x251   : > { %2223 = vst [vmem:[%s4006_s28 + $0x30] sm:$0xff] %v4054_v31  ;;  %1845 = vmatpush.bf16.msrb.mxu1 %v2727_v19 }
 0x252   : > { %1274 = vmatmul.bf16.gmra.mxu2 %v3963_v50  ;;  %v1527_v38 = vmax.f32 %v1460_v58, 0.0 }
 0x255   : > { %v1235_v39 = vpop.f32.mrf.mxu2 }
 0x256   : > { %v2901_v4 = vpop.eup %2900  ;;  %v1236_v57 = vadd.f32 %v3993_v37, %v1235_v39 }
 0x257   : > { %v4062_v8 = vmul.f32 %v2901_v4, %v3999_v40  ;;  %v1461_v48 = vpop.f32.mrf.mxu3 }
 0x258   : > { %2902 = vtanh.f32 %v1236_v57  ;;  %v1462_v47 = vadd.f32 %v3987_v62, %v1461_v48 }
 0x259   : > { %2224 = vst [vmem:[%s4006_s28 + $0x38] sm:$0xff] %v4062_v8 }
 0x25a   : > { %v1528_v50 = vmax.f32 %v1462_v47, 0.0 }
 0x25c   : > { %v1555_v60 = vpack.c.bf16 %v1528_v50, %v1527_v38  ;;  %1503 = vmatmul.bf16.gmra.mxu3 %v3829_v5 }
 0x25d   : > { %v1237_v11 = vpop.f32.mrf.mxu2 }
 0x25e   : > { %v2903_v7 = vpop.eup %2902  ;;  %v1238_v9 = vadd.f32 %v3993_v37, %v1237_v11  ;;  %1663 = vmatmul.bf16.gmra.mxu0 %v1555_v60 }
 0x25f   : > { %v4070_v27 = vmul.f32 %v2903_v7, %v3999_v40  ;;  %v1464_v6 = vpop.f32.mrf.mxu3 }
 0x260   : > { %2904 = vtanh.f32 %v1238_v9  ;;  %v1465_v5 = vadd.f32 %v3987_v62, %v1464_v6  ;;  %v2726_v6 = vld [vmem:[#allocation14 + $0x8] sm:$0xff] }
 0x261   : > { %2225 = vst [vmem:[%s4006_s28 + $0x40] sm:$0xff] %v4070_v27  ;;  %1846 = vmatpush.bf16.msrb.mxu1 %v2726_v6 }
 0x262   : > { %1279 = vmatmul.bf16.gmra.mxu2 %v3970_v10  ;;  %v1529_v48 = vmax.f32 %v1465_v5, 0.0 }
 0x265   : > { %v1240_v16 = vpop.f32.mrf.mxu2 }
 0x266   : > { %v2905_v39 = vpop.eup %2904  ;;  %v1241_v17 = vadd.f32 %v3993_v37, %v1240_v16 }
 0x267   : > { %v4078_v4 = vmul.f32 %v2905_v39, %v3999_v40  ;;  %v1466_v58 = vpop.f32.mrf.mxu3 }
 0x268   : > { %2906 = vtanh.f32 %v1241_v17  ;;  %v1467_v57 = vadd.f32 %v3987_v62, %v1466_v58 }
 0x269   : > { %2226 = vst [vmem:[%s4006_s28 + $0x48] sm:$0xff] %v4078_v4 }
 0x26a   : > { %v1530_v10 = vmax.f32 %v1467_v57, 0.0 }
 0x26c   : > { %v1556_v47 = vpack.c.bf16 %v1530_v10, %v1529_v48  ;;  %1508 = vmatmul.bf16.gmra.mxu3 %v3855_v32 }
 0x26d   : > { %v1242_v38 = vpop.f32.mrf.mxu2 }
 0x26e   : > { %v2907_v50 = vpop.eup %2906  ;;  %v1243_v60 = vadd.f32 %v3993_v37, %v1242_v38  ;;  %1668 = vmatmul.bf16.gmra.mxu0 %v1556_v47 }
 0x26f   : > { %v4086_v11 = vmul.f32 %v2907_v50, %v3999_v40  ;;  %v1469_v7 = vpop.f32.mrf.mxu3 }
 0x270   : > { %2908 = vtanh.f32 %v1243_v60  ;;  %v1470_v32 = vadd.f32 %v3987_v62, %v1469_v7  ;;  %v2725_v7 = vld [vmem:[#allocation14] sm:$0xff] }
 0x271   : > { %2227 = vst [vmem:[%s4006_s28 + $0x50] sm:$0xff] %v4086_v11  ;;  %1847 = vmatpush.bf16.msrb.mxu1 %v2725_v7 }
 0x272   : > { %1284 = vmatmul.bf16.gmra.mxu2 %v3977_v49  ;;  %v1531_v58 = vmax.f32 %v1470_v32, 0.0 }
 0x275   : > { %v1245_v9 = vpop.f32.mrf.mxu2 }
 0x276   : > { %v2909_v16 = vpop.eup %2908  ;;  %v1246_v19 = vadd.f32 %v3993_v37, %v1245_v9 }
 0x277   : > { %v4094_v39 = vmul.f32 %v2909_v16, %v3999_v40  ;;  %v1471_v5 = vpop.f32.mrf.mxu3 }
 0x278   : > { %2910 = vtanh.f32 %v1246_v19  ;;  %v1472_v17 = vadd.f32 %v3987_v62, %v1471_v5 }
 0x279   : > { %2228 = vst [vmem:[%s4006_s28 + $0x58] sm:$0xff] %v4094_v39 }
 0x27a   : > { %v1532_v49 = vmax.f32 %v1472_v17, 0.0 }
 0x27c   : > { %v1557_v57 = vpack.c.bf16 %v1532_v49, %v1531_v58  ;;  %1513 = vmatmul.bf16.gmra.mxu3 %v3881_v63 }
 0x27d   : > { %v1247_v48 = vpop.f32.mrf.mxu2 }
 0x27e   : > { %v2911_v10 = vpop.eup %2910  ;;  %v1248_v47 = vadd.f32 %v3993_v37, %v1247_v48  ;;  %1673 = vmatmul.bf16.gmra.mxu0 %v1557_v57 }
 0x27f   : > { %v4102_v38 = vmul.f32 %v2911_v10, %v3999_v40  ;;  %v1474_v50 = vpop.f32.mrf.mxu3 }
 0x280   : > { %2912 = vtanh.f32 %v1248_v47  ;;  %v1475_v63 = vadd.f32 %v3987_v62, %v1474_v50 }
 0x281   : > { %2229 = vst [vmem:[%s4006_s28 + $0x60] sm:$0xff] %v4102_v38 }
 0x282   : > { %1289 = vmatmul.bf16.gmra.mxu2 %v3982_v42  ;;  %v1533_v5 = vmax.f32 %v1475_v63, 0.0 }
 0x285   : > { %v1250_v60 = vpop.f32.mrf.mxu2 }
 0x286   : > { %v2913_v9 = vpop.eup %2912  ;;  %v1251_v6 = vadd.f32 %v3993_v37, %v1250_v60 }
 0x287   : > { %v4110_v16 = vmul.f32 %v2913_v9, %v3999_v40  ;;  %v1476_v32 = vpop.f32.mrf.mxu3 }
 0x288   : > { %2914 = vtanh.f32 %v1251_v6  ;;  %v1477_v19 = vadd.f32 %v3987_v62, %v1476_v32 }
 0x289   : > { %2230 = vst [vmem:[%s4006_s28 + $0x68] sm:$0xff] %v4110_v16 }
 0x28a   : > { %v1534_v42 = vmax.f32 %v1477_v19, 0.0 }
 0x28c   : > { %v1558_v17 = vpack.c.bf16 %v1534_v42, %v1533_v5 }
 0x28d   : > { %v1252_v58 = vpop.f32.mrf.mxu2 }
 0x28e   : > { %v2915_v49 = vpop.eup %2914  ;;  %v1253_v57 = vadd.f32 %v3993_v37, %v1252_v58  ;;  %1678 = vmatmul.bf16.gmra.mxu0 %v1558_v17 }
 0x28f   : > { %v4117_v48 = vmul.f32 %v2915_v49, %v3999_v40  ;;  %v1479_v10 = vpop.f32.mrf.mxu3  ;;  %v4132_v49 = vld [vmem:[%s4577_s11] ss:$0 sm:$0xff] }
 0x290   : > { %2916 = vtanh.f32 %v1253_v57  ;;  %v1480_v60 = vadd.f32 %v3987_v62, %v1479_v10 }
 0x291   : > { %2231 = vst [vmem:[%s4006_s28 + $0x70] sm:$0xff] %v4117_v48 }
 0x292   : > { %v1535_v32 = vmax.f32 %v1480_v60, 0.0 }
 0x295   : > { %v1255_v47 = vpop.f32.mrf.mxu2 }
 0x296   : > { %v2917_v50 = vpop.eup %2916  ;;  %v1256_v7 = vadd.f32 %v3993_v37, %v1255_v47 }
 0x297   : > { %v4124_v9 = vmul.f32 %v2917_v50, %v3999_v40  ;;  %v1481_v63 = vpop.f32.mrf.mxu3 }
 0x298   : > { %2918 = vtanh.f32 %v1256_v7  ;;  %v1482_v6 = vadd.f32 %v3987_v62, %v1481_v63 }
 0x299   : > { %2232 = vst [vmem:[%s4006_s28 + $0x78] sm:$0xff] %v4124_v9 }
 0x29a   : > { %v1536_v19 = vmax.f32 %v1482_v6, 0.0 }
 0x29b   : > { %v1644_v5 = vpop.f32.mrf.mxu0 }
 0x29c   : > { %v1559_v42 = vpack.c.bf16 %v1536_v19, %v1535_v32  ;;  %v1645_v50 = vadd.f32 %v4132_v49, %v1644_v5 }
 0x29d   : > { %v1257_v17 = vpop.f32.mrf.mxu2 }
 0x29e   : > { %v2919_v58 = vpop.eup %2918  ;;  %v1258_v57 = vadd.f32 %v3993_v37, %v1257_v17  ;;  %1683 = vmatmul.bf16.gmra.mxu0 %v1559_v42  ;;  %v1724_v32 = vmax.f32 %v1645_v50, 0.0 }
 0x29f   : > { %v4136_v10 = vmul.f32 %v2919_v58, %v3999_v40  ;;  %v1484_v47 = vpop.f32.mrf.mxu3 }
 0x2a0   : > { %2920 = vtanh.f32 %v1258_v57  ;;  %v1485_v19 = vadd.f32 %v3987_v62, %v1484_v47 }
 0x2a1   : > { %2233 = vst [vmem:[%s4006_s28 + $0x80] sm:$0xff] %v4136_v10 }
 0x2a3   : > { %v1646_v60 = vpop.f32.mrf.mxu0 }
 0x2a4   : > { %v1647_v7 = vadd.f32 %v4132_v49, %v1646_v60  ;;  %v1537_v60 = vmax.f32 %v1485_v19, 0.0 }
 0x2a5   : > { %v1260_v63 = vpop.f32.mrf.mxu2 }
 0x2a6   : > { %v2921_v6 = vpop.eup %2920  ;;  %v1725_v17 = vmax.f32 %v1647_v7, 0.0  ;;  %v1261_v42 = vadd.f32 %v3993_v37, %v1260_v63 }
 0x2a7   : > { %v4145_v58 = vmul.f32 %v2921_v6, %v3999_v40  ;;  %v1486_v57 = vpop.f32.mrf.mxu3 }
 0x2a8   : > { %2922 = vtanh.f32 %v1261_v42  ;;  %v1487_v29 = vadd.f32 %v3987_v62, %v1486_v57  ;;  %v1756_v5 = vpack.c.bf16 %v1725_v17, %v1724_v32 }
 0x2a9   : > { %2234 = vst [vmem:[%s4006_s28 + $0x88] sm:$0xff] %v4145_v58 }
 0x2aa   : > { %v1538_v22 = vmax.f32 %v1487_v29, 0.0  ;;  %1848 = vmatmul.bf16.vlgmr.msrb.gmra.mxu1 %v1756_v5 }
 0x2ab   : > { %v1649_v50 = vpop.f32.mrf.mxu0 }
 0x2ac   : > { %v1560_v3 = vpack.c.bf16 %v1538_v22, %v1537_v60  ;;  %v1650_v32 = vadd.f32 %v4132_v49, %v1649_v50 }
 0x2ad   : > { %v1262_v47 = vpop.f32.mrf.mxu2 }
 0x2ae   : > { %v2923_v7 = vpop.eup %2922  ;;  %v1263_v63 = vadd.f32 %v3993_v37, %v1262_v47  ;;  %1688 = vmatmul.bf16.gmra.mxu0 %v1560_v3  ;;  %v1726_v57 = vmax.f32 %v1650_v32, 0.0 }
 0x2af   : > { %v4152_v6 = vmul.f32 %v2923_v7, %v3999_v40  ;;  %v1489_v42 = vpop.f32.mrf.mxu3 }
 0x2b0   : > { %2924 = vtanh.f32 %v1263_v63  ;;  %v1490_v5 = vadd.f32 %v3987_v62, %v1489_v42 }
 0x2b1   : > { %2235 = vst [vmem:[%s4006_s28 + $0x90] sm:$0xff] %v4152_v6 }
 0x2b3   : > { %v1651_v19 = vpop.f32.mrf.mxu0 }
 0x2b4   : > { %v1652_v29 = vadd.f32 %v4132_v49, %v1651_v19  ;;  %v1539_v19 = vmax.f32 %v1490_v5, 0.0 }
 0x2b5   : > { %v1265_v17 = vpop.f32.mrf.mxu2 }
 0x2b6   : > { %v2925_v22 = vpop.eup %2924  ;;  %v1727_v60 = vmax.f32 %v1652_v29, 0.0  ;;  %v1266_v3 = vadd.f32 %v3993_v37, %v1265_v17 }
 0x2b7   : > { %v4161_v47 = vmul.f32 %v2925_v22, %v3999_v40  ;;  %v1491_v7 = vpop.f32.mrf.mxu3 }
 0x2b8   : > { %2926 = vtanh.f32 %v1266_v3  ;;  %v1492_v63 = vadd.f32 %v3987_v62, %v1491_v7  ;;  %v1757_v50 = vpack.c.bf16 %v1727_v60, %v1726_v57 }
 0x2b9   : > { %2236 = vst [vmem:[%s4006_s28 + $0x98] sm:$0xff] %v4161_v47 }
 0x2ba   : > { %v1540_v2 = vmax.f32 %v1492_v63, 0.0  ;;  %1853 = vmatmul.bf16.gmra.mxu1 %v1757_v50 }
 0x2bb   : > { %v1654_v32 = vpop.f32.mrf.mxu0 }
 0x2bc   : > { %v1561_v56 = vpack.c.bf16 %v1540_v2, %v1539_v19  ;;  %v1655_v57 = vadd.f32 %v4132_v49, %v1654_v32 }
 0x2bd   : > { %v1267_v42 = vpop.f32.mrf.mxu2 }
 0x2be   : > { %v2927_v29 = vpop.eup %2926  ;;  %v1268_v17 = vadd.f32 %v3993_v37, %v1267_v42  ;;  %1693 = vmatmul.bf16.gmra.mxu0 %v1561_v56  ;;  %v1728_v63 = vmax.f32 %v1655_v57, 0.0 }
 0x2bf   : > { %v4168_v22 = vmul.f32 %v2927_v29, %v3999_v40  ;;  %v1494_v3 = vpop.f32.mrf.mxu3 }
 0x2c0   : > { %2928 = vtanh.f32 %v1268_v17  ;;  %v1495_v50 = vadd.f32 %v3987_v62, %v1494_v3 }
 0x2c1   : > { %2237 = vst [vmem:[%s4006_s28 + $0xa0] sm:$0xff] %v4168_v22 }
 0x2c3   : > { %v1656_v5 = vpop.f32.mrf.mxu0 }
 0x2c4   : > { %v1657_v60 = vadd.f32 %v4132_v49, %v1656_v5  ;;  %v1541_v5 = vmax.f32 %v1495_v50, 0.0 }
 0x2c5   : > { %v1270_v7 = vpop.f32.mrf.mxu2 }
 0x2c6   : > { %v2929_v2 = vpop.eup %2928  ;;  %v1729_v19 = vmax.f32 %v1657_v60, 0.0  ;;  %v1271_v56 = vadd.f32 %v3993_v37, %v1270_v7 }
 0x2c7   : > { %v4177_v42 = vmul.f32 %v2929_v2, %v3999_v40  ;;  %v1496_v29 = vpop.f32.mrf.mxu3 }
 0x2c8   : > { %2930 = vtanh.f32 %v1271_v56  ;;  %v1497_v17 = vadd.f32 %v3987_v62, %v1496_v29  ;;  %v1758_v32 = vpack.c.bf16 %v1729_v19, %v1728_v63 }
 0x2c9   : > { %2238 = vst [vmem:[%s4006_s28 + $0xa8] sm:$0xff] %v4177_v42 }
 0x2ca   : > { %v1542_v55 = vmax.f32 %v1497_v17, 0.0  ;;  %1858 = vmatmul.bf16.gmra.mxu1 %v1758_v32 }
 0x2cb   : > { %v1659_v57 = vpop.f32.mrf.mxu0 }
 0x2cc   : > { %v1562_v46 = vpack.c.bf16 %v1542_v55, %v1541_v5  ;;  %v1660_v63 = vadd.f32 %v4132_v49, %v1659_v57 }
 0x2cd   : > { %v1272_v3 = vpop.f32.mrf.mxu2 }
 0x2ce   : > { %v2931_v60 = vpop.eup %2930  ;;  %v1273_v7 = vadd.f32 %v3993_v37, %v1272_v3  ;;  %1698 = vmatmul.bf16.gmra.mxu0 %v1562_v46  ;;  %v1730_v17 = vmax.f32 %v1660_v63, 0.0 }
 0x2cf   : > { %v4184_v2 = vmul.f32 %v2931_v60, %v3999_v40  ;;  %v1499_v56 = vpop.f32.mrf.mxu3 }
 0x2d0   : > { %2932 = vtanh.f32 %v1273_v7  ;;  %v1500_v32 = vadd.f32 %v3987_v62, %v1499_v56 }
 0x2d1   : > { %2239 = vst [vmem:[%s4006_s28 + $0xb0] sm:$0xff] %v4184_v2 }
 0x2d3   : > { %v1661_v50 = vpop.f32.mrf.mxu0 }
 0x2d4   : > { %v1662_v19 = vadd.f32 %v4132_v49, %v1661_v50  ;;  %v1543_v50 = vmax.f32 %v1500_v32, 0.0 }
 0x2d5   : > { %v1275_v29 = vpop.f32.mrf.mxu2 }
 0x2d6   : > { %v2933_v55 = vpop.eup %2932  ;;  %v1731_v5 = vmax.f32 %v1662_v19, 0.0  ;;  %v1276_v46 = vadd.f32 %v3993_v37, %v1275_v29 }
 0x2d7   : > { %v4193_v3 = vmul.f32 %v2933_v55, %v3999_v40  ;;  %v1501_v60 = vpop.f32.mrf.mxu3 }
 0x2d8   : > { %2934 = vtanh.f32 %v1276_v46  ;;  %v1502_v7 = vadd.f32 %v3987_v62, %v1501_v60  ;;  %v1759_v57 = vpack.c.bf16 %v1731_v5, %v1730_v17 }
 0x2d9   : > { %4638 = vst [vmem:[#allocation37_spill] sm:$0xff] %v4193_v3 }
 0x2da   : > { %2240 = vst [vmem:[%s4006_s28 + $0xb8] sm:$0xff] %v4193_v3  ;;  %v1544_v45 = vmax.f32 %v1502_v7, 0.0  ;;  %1863 = vmatmul.bf16.gmra.mxu1 %v1759_v57 }
 0x2db   : > { %v1664_v63 = vpop.f32.mrf.mxu0 }
 0x2dc   : > { %v1563_v36 = vpack.c.bf16 %v1544_v45, %v1543_v50  ;;  %v1665_v17 = vadd.f32 %v4132_v49, %v1664_v63 }
 0x2dd   : > { %v1277_v56 = vpop.f32.mrf.mxu2 }
 0x2de   : > { %v2935_v19 = vpop.eup %2934  ;;  %v1278_v29 = vadd.f32 %v3993_v37, %v1277_v56  ;;  %1703 = vmatmul.bf16.gmra.mxu0 %v1563_v36  ;;  %v1732_v7 = vmax.f32 %v1665_v17, 0.0 }
 0x2df   : > { %v4200_v55 = vmul.f32 %v2935_v19, %v3999_v40  ;;  %v1504_v46 = vpop.f32.mrf.mxu3 }
 0x2e0   : > { %2936 = vtanh.f32 %v1278_v29  ;;  %v1505_v57 = vadd.f32 %v3987_v62, %v1504_v46 }
 0x2e1   : > { %4639 = vst [vmem:[#allocation38_spill] sm:$0xff] %v4200_v55 }
 0x2e2   : > { %2241 = vst [vmem:[%s4006_s28 + $0xc0] sm:$0xff] %v4200_v55 }
 0x2e3   : > { %v1666_v32 = vpop.f32.mrf.mxu0 }
 0x2e4   : > { %v1667_v5 = vadd.f32 %v4132_v49, %v1666_v32  ;;  %v1545_v32 = vmax.f32 %v1505_v57, 0.0 }
 0x2e5   : > { %v1280_v60 = vpop.f32.mrf.mxu2 }
 0x2e6   : > { %v2937_v45 = vpop.eup %2936  ;;  %v1733_v50 = vmax.f32 %v1667_v5, 0.0  ;;  %v1281_v36 = vadd.f32 %v3993_v37, %v1280_v60 }
 0x2e7   : > { %v4209_v56 = vmul.f32 %v2937_v45, %v3999_v40  ;;  %v1506_v19 = vpop.f32.mrf.mxu3 }
 0x2e8   : > { %v1760_v29 = vpack.c.bf16 %v1733_v50, %v1732_v7  ;;  %2938 = vtanh.f32 %v1281_v36  ;;  %v1507_v63 = vadd.f32 %v3987_v62, %v1506_v19 }
 0x2e9   : > { %4640 = vst [vmem:[#allocation39_spill] sm:$0xff] %v4209_v56 }
 0x2ea   : > { %2242 = vst [vmem:[%s4006_s28 + $0xc8] sm:$0xff] %v4209_v56  ;;  %v1546_v55 = vmax.f32 %v1507_v63, 0.0  ;;  %1868 = vmatmul.bf16.gmra.mxu1 %v1760_v29 }
 0x2eb   : > { %v1669_v17 = vpop.f32.mrf.mxu0 }
 0x2ec   : > { %v1564_v3 = vpack.c.bf16 %v1546_v55, %v1545_v32  ;;  %v1670_v50 = vadd.f32 %v4132_v49, %v1669_v17 }
 0x2ed   : > { %v1282_v46 = vpop.f32.mrf.mxu2 }
 0x2ee   : > { %v2939_v5 = vpop.eup %2938  ;;  %v1283_v60 = vadd.f32 %v3993_v37, %v1282_v46  ;;  %1708 = vmatmul.bf16.gmra.mxu0 %v1564_v3  ;;  %v1734_v29 = vmax.f32 %v1670_v50, 0.0 }
 0x2ef   : > { %v4216_v45 = vmul.f32 %v2939_v5, %v3999_v40  ;;  %v1509_v7 = vpop.f32.mrf.mxu3 }
 0x2f0   : > { %2940 = vtanh.f32 %v1283_v60  ;;  %v1510_v63 = vadd.f32 %v3987_v62, %v1509_v7 }
 0x2f1   : > { %4641 = vst [vmem:[#allocation40_spill] sm:$0xff] %v4216_v45 }
 0x2f2   : > { %2243 = vst [vmem:[%s4006_s28 + $0xd0] sm:$0xff] %v4216_v45 }
 0x2f3   : > { %v1671_v57 = vpop.f32.mrf.mxu0 }
 0x2f4   : > { %v1672_v36 = vadd.f32 %v4132_v49, %v1671_v57  ;;  %v1547_v57 = vmax.f32 %v1510_v63, 0.0 }
 0x2f5   : > { %v1285_v19 = vpop.f32.mrf.mxu2 }
 0x2f6   : > { %v2941_v55 = vpop.eup %2940  ;;  %v1735_v32 = vmax.f32 %v1672_v36, 0.0  ;;  %v1286_v3 = vadd.f32 %v3993_v37, %v1285_v19 }
 0x2f7   : > { %v4225_v46 = vmul.f32 %v2941_v55, %v3999_v40  ;;  %v1511_v5 = vpop.f32.mrf.mxu3 }
 0x2f8   : > { %v1761_v60 = vpack.c.bf16 %v1735_v32, %v1734_v29  ;;  %2942 = vtanh.f32 %v1286_v3  ;;  %v1512_v17 = vadd.f32 %v3987_v62, %v1511_v5 }
 0x2f9   : > { %4642 = vst [vmem:[#allocation41_spill] sm:$0xff] %v4225_v46 }
 0x2fa   : > { %2244 = vst [vmem:[%s4006_s28 + $0xd8] sm:$0xff] %v4225_v46  ;;  %v1548_v45 = vmax.f32 %v1512_v17, 0.0  ;;  %1873 = vmatmul.bf16.gmra.mxu1 %v1761_v60 }
 0x2fb   : > { %v1674_v50 = vpop.f32.mrf.mxu0 }
 0x2fc   : > { %v1565_v56 = vpack.c.bf16 %v1548_v45, %v1547_v57  ;;  %v1675_v32 = vadd.f32 %v4132_v49, %v1674_v50 }
 0x2fd   : > { %v1287_v7 = vpop.f32.mrf.mxu2 }
 0x2fe   : > { %v2943_v36 = vpop.eup %2942  ;;  %v1288_v19 = vadd.f32 %v3993_v37, %v1287_v7  ;;  %1713 = vmatmul.bf16.gmra.mxu0 %v1565_v56  ;;  %v1736_v60 = vmax.f32 %v1675_v32, 0.0 }
 0x2ff   : > { %v4232_v55 = vmul.f32 %v2943_v36, %v3999_v40  ;;  %v1514_v29 = vpop.f32.mrf.mxu3 }
 0x300   : > { %2944 = vtanh.f32 %v1288_v19  ;;  %v1515_v17 = vadd.f32 %v3987_v62, %v1514_v29 }
 0x301   : > { %4643 = vst [vmem:[#allocation42_spill] sm:$0xff] %v4232_v55 }
 0x302   : > { %2245 = vst [vmem:[%s4006_s28 + $0xe0] sm:$0xff] %v4232_v55 }
 0x303   : > { %v1676_v63 = vpop.f32.mrf.mxu0 }
 0x304   : > { %v1677_v3 = vadd.f32 %v4132_v49, %v1676_v63  ;;  %v1549_v63 = vmax.f32 %v1515_v17, 0.0 }
 0x305   : > { %v1290_v5 = vpop.f32.mrf.mxu2 }
 0x306   : > { %v2945_v45 = vpop.eup %2944  ;;  %v1737_v57 = vmax.f32 %v1677_v3, 0.0  ;;  %v1291_v56 = vadd.f32 %v3993_v37, %v1290_v5 }
 0x307   : > { %v4241_v7 = vmul.f32 %v2945_v45, %v3999_v40  ;;  %v1516_v36 = vpop.f32.mrf.mxu3 }
 0x308   : > { %v1762_v19 = vpack.c.bf16 %v1737_v57, %v1736_v60  ;;  %2946 = vtanh.f32 %v1291_v56  ;;  %v1517_v50 = vadd.f32 %v3987_v62, %v1516_v36 }
 0x309   : > { %2246 = vst [vmem:[%s4006_s28 + $0xe8] sm:$0xff] %v4241_v7 }
 0x30a   : > { %v1550_v55 = vmax.f32 %v1517_v50, 0.0  ;;  %1878 = vmatmul.bf16.gmra.mxu1 %v1762_v19 }
 0x30b   : > { %v1679_v32 = vpop.f32.mrf.mxu0 }
 0x30c   : > { %v1566_v46 = vpack.c.bf16 %v1550_v55, %v1549_v63  ;;  %v1680_v62 = vadd.f32 %v4132_v49, %v1679_v32 }
 0x30d   : > { %v1292_v29 = vpop.f32.mrf.mxu2 }
 0x30e   : > { %v2947_v3 = vpop.eup %2946  ;;  %v1293_v5 = vadd.f32 %v3993_v37, %v1292_v29  ;;  %1718 = vmatmul.bf16.gmra.mxu0 %v1566_v46  ;;  %v1738_v56 = vmax.f32 %v1680_v62, 0.0  ;;  %v2025_v46 = vsub.f32 0.0, %v4003_v51  ;;  %v4265_v29 = vld [vmem:[%s4645_s2] ss:$0 sm:$0xff]  ;;  %v2026_v51 = vsub.f32 0.0, %v4014_v18 }
 0x30f   : > { %v4248_v45 = vmul.f32 %v2947_v3, %v3999_v40 }
 0x310   : > { %2948 = vtanh.f32 %v1293_v5  ;;  %v2057_v3 = vmul.f32 1.442695, %v2025_v46 }
 0x311   : > { %2247 = vst [vmem:[%s4006_s28 + $0xf0] sm:$0xff] %v4248_v45 }
 0x312   : > { %2950 = vpow2.f32 %v2057_v3  ;;  %v2027_v3 = vsub.f32 0.0, %v4022_v61 }
 0x313   : > { %v1681_v60 = vpop.f32.mrf.mxu0 }
 0x314   : > { %v1682_v17 = vadd.f32 %v4132_v49, %v1681_v60 }
 0x316   : > { %v2949_v57 = vpop.eup %2948  ;;  %v1739_v55 = vmax.f32 %v1682_v17, 0.0 }
 0x317   : > { %v4255_v36 = vmul.f32 %v2949_v57, %v3999_v40 }
 0x318   : > { %v1763_v19 = vpack.c.bf16 %v1739_v55, %v1738_v56 }
 0x319   : > { %4644 = vst [vmem:[#allocation43_spill] sm:$0xff] %v4255_v36 }
 0x31a   : > { %2248 = vst [vmem:[%s4006_s28 + $0xf8] sm:$0xff] %v4255_v36  ;;  %1883 = vmatmul.bf16.gmra.mxu1 %v1763_v19  ;;  %v3014_v19 = vld [vmem:[%s3653_s12] sm:$0xff]  ;;  %s3306_s28 = scalar_lea.hbm %s4646_s27, 512 }
 0x31b   : > { %v1684_v37 = vpop.f32.mrf.mxu0  ;;  %p3308_p7 = scmp.lt.s32.totalorder %s3306_s28, %s3302_s14 }
 0x31c   : > { %v1685_v50 = vadd.f32 %v4132_v49, %v1684_v37 }
 0x31d   : > { %p3309_p8 = por %p3308_p7, %p3307_p13 }
 0x31e   : > { %v1740_v5 = vmax.f32 %v1685_v50, 0.0  ;;  %v2951_v50 = vpop.eup %2950 }
 0x31f   : > { %p3310_p9 = pnand %p3309_p8, %p3305_p4 }
 0x323   : > { %v1686_v63 = vpop.f32.mrf.mxu0 }
 0x324   : > { %v1687_v32 = vadd.f32 %v4132_v49, %v1686_v63  ;;  %v2059_v63 = vmul.f32 1.442695, %v2026_v51 }
 0x326   : > { %v1741_v62 = vmax.f32 %v1687_v32, 0.0  ;;  %2952 = vpow2.f32 %v2059_v63 }
 0x327   : > { %v1849_v60 = vpop.f32.mrf.mxu1 }
 0x328   : > { %v1764_v17 = vpack.c.bf16 %v1741_v62, %v1740_v5  ;;  %v1850_v57 = vadd.f32 %v4265_v29, %v1849_v60 }
 0x32a   : > { %v1929_v56 = vmul.f32 %v1850_v57, %v3999_v40  ;;  %1888 = vmatmul.bf16.gmra.mxu1 %v1764_v17  ;;  %v3015_v57 = vld [vmem:[%s3653_s12 + $0x8] sm:$0xff] }
 0x32b   : > { %v1689_v55 = vpop.f32.mrf.mxu0 }
 0x32c   : > { %v1961_v37 = vsub.f32 %v3014_v19, %v1929_v56  ;;  %v1690_v62 = vadd.f32 %v4132_v49, %v1689_v55  ;;  %v2061_v19 = vmul.f32 1.442695, %v2027_v3 }
 0x32e   : > { %v1993_v46 = vmul.f32 %v1961_v37, %v3999_v40  ;;  %v1742_v37 = vmax.f32 %v1690_v62, 0.0  ;;  %2954 = vpow2.f32 %v2061_v19  ;;  %v3016_v62 = vld [vmem:[%s3653_s12 + $0x10] sm:$0xff] }
 0x32f   : > { %v1851_v32 = vpop.f32.mrf.mxu1 }
 0x330   : > { %v2121_v36 = vmul.f32 %v2951_v50, %v1993_v46  ;;  %v1852_v5 = vadd.f32 %v4265_v29, %v1851_v32  ;;  %v2028_v32 = vsub.f32 0.0, %v4030_v30 }
 0x332   : > { %v2153_v18 = vadd.f32 %v2121_v36, %v3682_v12  ;;  %v1930_v60 = vmul.f32 %v1852_v5, %v3999_v40  ;;  %v2953_v36 = vpop.eup %2952 }
 0x333   : > { %v1691_v17 = vpop.f32.mrf.mxu0 }
 0x334   : > { %2185 = vst [vmem:[%s4278_s6] sm:$0xff] %v2153_v18  ;;  %v1962_v51 = vsub.f32 %v3015_v57, %v1930_v60  ;;  %v1692_v56 = vadd.f32 %v4132_v49, %v1691_v17  ;;  %v2063_v17 = vmul.f32 1.442695, %v2028_v32 }
 0x336   : > { %v1994_v61 = vmul.f32 %v1962_v51, %v3999_v40  ;;  %v1743_v12 = vmax.f32 %v1692_v56, 0.0  ;;  %v2955_v51 = vpop.eup %2954  ;;  %2956 = vpow2.f32 %v2063_v17  ;;  %v2030_v17 = vsub.f32 0.0, %v4046_v28 }
 0x337   : > { %v1854_v55 = vpop.f32.mrf.mxu1 }
 0x338   : > { %v2122_v63 = vmul.f32 %v2953_v36, %v1994_v61  ;;  %v1765_v46 = vpack.c.bf16 %v1743_v12, %v1742_v37  ;;  %v1855_v50 = vadd.f32 %v4265_v29, %v1854_v55  ;;  %v3017_v55 = vld [vmem:[%s3653_s12 + $0x18] sm:$0xff] }
 0x33a   : > { %v2154_v5 = vadd.f32 %v2122_v63, %v3685_v13  ;;  %v1931_v18 = vmul.f32 %v1855_v50, %v3999_v40  ;;  %1893 = vmatmul.bf16.gmra.mxu1 %v1765_v46  ;;  %v2029_v13 = vsub.f32 0.0, %v4038_v41 }
 0x33b   : > { %v1694_v3 = vpop.f32.mrf.mxu0 }
 0x33c   : > { %2186 = vst [vmem:[%s4278_s6 + $0x8] sm:$0xff] %v2154_v5  ;;  %v1963_v60 = vsub.f32 %v3016_v62, %v1931_v18  ;;  %v1695_v61 = vadd.f32 %v4132_v49, %v1694_v3  ;;  %v2065_v50 = vmul.f32 1.442695, %v2029_v13  ;;  %v2957_v41 = vpop.eup %2956  ;;  %v2067_v13 = vmul.f32 1.442695, %v2030_v17 }
 0x33e   : > { %v1995_v57 = vmul.f32 %v1963_v60, %v3999_v40  ;;  %v1744_v32 = vmax.f32 %v1695_v61, 0.0  ;;  %2958 = vpow2.f32 %v2065_v50 }
 0x33f   : > { %v1856_v56 = vpop.f32.mrf.mxu1  ;;  %2960 = vpow2.f32 %v2067_v13  ;;  %v3020_v13 = vld [vmem:[%s3653_s12 + $0x30] sm:$0xff] }
 0x340   : > { %v2123_v37 = vmul.f32 %v2955_v51, %v1995_v57  ;;  %v1857_v19 = vadd.f32 %v4265_v29, %v1856_v56 }
 0x342   : > { %v2155_v30 = vadd.f32 %v2123_v37, %v3708_v23  ;;  %v1932_v12 = vmul.f32 %v1857_v19, %v3999_v40  ;;  %v3018_v37 = vld [vmem:[%s3653_s12 + $0x20] sm:$0xff] }
 0x343   : > { %v1696_v36 = vpop.f32.mrf.mxu0 }
 0x344   : > { %2187 = vst [vmem:[%s4278_s6 + $0x10] sm:$0xff] %v2155_v30  ;;  %v1964_v63 = vsub.f32 %v3017_v55, %v1932_v12  ;;  %v1697_v46 = vadd.f32 %v4132_v49, %v1696_v36  ;;  %v2959_v61 = vpop.eup %2958 }
 0x346   : > { %v1996_v5 = vmul.f32 %v1964_v63, %v3999_v40  ;;  %v1745_v18 = vmax.f32 %v1697_v46, 0.0 }
 0x347   : > { %v1859_v62 = vpop.f32.mrf.mxu1 }
 0x348   : > { %v2124_v23 = vmul.f32 %v2957_v41, %v1996_v5  ;;  %v1766_v60 = vpack.c.bf16 %v1745_v18, %v1744_v32  ;;  %v1860_v3 = vadd.f32 %v4265_v29, %v1859_v62  ;;  %v3019_v32 = vld [vmem:[%s3653_s12 + $0x28] sm:$0xff] }
 0x34a   : > { %v2156_v57 = vadd.f32 %v2124_v23, %v3711_v24  ;;  %v1933_v51 = vmul.f32 %v1860_v3, %v3999_v40  ;;  %1898 = vmatmul.bf16.gmra.mxu1 %v1766_v60  ;;  %v2031_v24 = vsub.f32 0.0, %v4054_v31  ;;  %v2961_v31 = vpop.eup %2960 }
 0x34b   : > { %v1699_v56 = vpop.f32.mrf.mxu0 }
 0x34c   : > { %2188 = vst [vmem:[%s4278_s6 + $0x18] sm:$0xff] %v2156_v57  ;;  %v1965_v19 = vsub.f32 %v3018_v37, %v1933_v51  ;;  %v1700_v63 = vadd.f32 %v4132_v49, %v1699_v56  ;;  %v2069_v41 = vmul.f32 1.442695, %v2031_v24  ;;  %v2032_v51 = vsub.f32 0.0, %v4062_v8 }
 0x34e   : > { %v1997_v30 = vmul.f32 %v1965_v19, %v3999_v40  ;;  %v1746_v62 = vmax.f32 %v1700_v63, 0.0  ;;  %2962 = vpow2.f32 %v2069_v41 }
 0x34f   : > { %v1861_v12 = vpop.f32.mrf.mxu1 }
 0x350   : > { %v2125_v36 = vmul.f32 %v2959_v61, %v1997_v30  ;;  %v1862_v55 = vadd.f32 %v4265_v29, %v1861_v12  ;;  %v2071_v61 = vmul.f32 1.442695, %v2032_v51 }
 0x352   : > { %v2157_v28 = vadd.f32 %v2125_v36, %v3734_v33  ;;  %v1934_v46 = vmul.f32 %v1862_v55, %v3999_v40  ;;  %2964 = vpow2.f32 %v2071_v61 }
 0x353   : > { %v1701_v50 = vpop.f32.mrf.mxu0 }
 0x354   : > { %2189 = vst [vmem:[%s4278_s6 + $0x20] sm:$0xff] %v2157_v28  ;;  %v1966_v5 = vsub.f32 %v3019_v32, %v1934_v46  ;;  %v1702_v18 = vadd.f32 %v4132_v49, %v1701_v50  ;;  %v2963_v36 = vpop.eup %2962  ;;  %v3021_v32 = vld [vmem:[%s3653_s12 + $0x38] sm:$0xff] }
 0x356   : > { %v1998_v23 = vmul.f32 %v1966_v5, %v3999_v40  ;;  %v1747_v60 = vmax.f32 %v1702_v18, 0.0 }
 0x357   : > { %v1864_v3 = vpop.f32.mrf.mxu1 }
 0x358   : > { %v2126_v33 = vmul.f32 %v2961_v31, %v1998_v23  ;;  %v1767_v17 = vpack.c.bf16 %v1747_v60, %v1746_v62  ;;  %v1865_v57 = vadd.f32 %v4265_v29, %v1864_v3 }
 0x35a   : > { %v2158_v56 = vadd.f32 %v2126_v33, %v3737_v34  ;;  %v1935_v37 = vmul.f32 %v1865_v57, %v3999_v40  ;;  %1903 = vmatmul.bf16.gmra.mxu1 %v1767_v17  ;;  %v2033_v34 = vsub.f32 0.0, %v4070_v27  ;;  %v2965_v27 = vpop.eup %2964  ;;  %v2034_v17 = vsub.f32 0.0, %v4078_v4 }
 0x35b   : > { %v1704_v19 = vpop.f32.mrf.mxu0 }
 0x35c   : > { %2190 = vst [vmem:[%s4278_s6 + $0x28] sm:$0xff] %v2158_v56  ;;  %v1967_v30 = vsub.f32 %v3020_v13, %v1935_v37  ;;  %v1705_v63 = vadd.f32 %v4132_v49, %v1704_v19  ;;  %v2073_v41 = vmul.f32 1.442695, %v2033_v34  ;;  %v3022_v37 = vld [vmem:[%s3653_s12 + $0x40] sm:$0xff]  ;;  %v2075_v13 = vmul.f32 1.442695, %v2034_v17 }
 0x35e   : > { %v1999_v12 = vmul.f32 %v1967_v30, %v3999_v40  ;;  %v1748_v62 = vmax.f32 %v1705_v63, 0.0  ;;  %2966 = vpow2.f32 %v2073_v41 }
 0x35f   : > { %v1866_v55 = vpop.f32.mrf.mxu1  ;;  %2968 = vpow2.f32 %v2075_v13 }
 0x360   : > { %v2127_v24 = vmul.f32 %v2963_v36, %v1999_v12  ;;  %v1867_v28 = vadd.f32 %v4265_v29, %v1866_v55 }
 0x362   : > { %v2159_v8 = vadd.f32 %v2127_v24, %v3760_v43  ;;  %v1936_v46 = vmul.f32 %v1867_v28, %v3999_v40 }
 0x363   : > { %v1706_v50 = vpop.f32.mrf.mxu0 }
 0x364   : > { %2191 = vst [vmem:[%s4278_s6 + $0x30] sm:$0xff] %v2159_v8  ;;  %v1968_v5 = vsub.f32 %v3021_v32, %v1936_v46  ;;  %v1707_v18 = vadd.f32 %v4132_v49, %v1706_v50  ;;  %v2967_v61 = vpop.eup %2966  ;;  %v3023_v8 = vld [vmem:[%s3653_s12 + $0x48] sm:$0xff] }
 0x366   : > { %v2000_v23 = vmul.f32 %v1968_v5, %v3999_v40  ;;  %v1749_v60 = vmax.f32 %v1707_v18, 0.0 }
 0x367   : > { %v1869_v31 = vpop.f32.mrf.mxu1 }
 0x368   : > { %v2128_v43 = vmul.f32 %v2965_v27, %v2000_v23  ;;  %v1768_v3 = vpack.c.bf16 %v1749_v60, %v1748_v62  ;;  %v1870_v33 = vadd.f32 %v4265_v29, %v1869_v31  ;;  %v2036_v60 = vsub.f32 0.0, %v4094_v39 }
 0x36a   : > { %v2160_v57 = vadd.f32 %v2128_v43, %v3763_v44  ;;  %v1937_v51 = vmul.f32 %v1870_v33, %v3999_v40  ;;  %1908 = vmatmul.bf16.gmra.mxu1 %v1768_v3  ;;  %v2035_v44 = vsub.f32 0.0, %v4086_v11  ;;  %v2969_v11 = vpop.eup %2968  ;;  %v3024_v3 = vld [vmem:[%s3653_s12 + $0x50] sm:$0xff]  ;;  %v2079_v17 = vmul.f32 1.442695, %v2036_v60 }
 0x36b   : > { %v1709_v56 = vpop.f32.mrf.mxu0 }
 0x36c   : > { %2192 = vst [vmem:[%s4278_s6 + $0x38] sm:$0xff] %v2160_v57  ;;  %v1969_v19 = vsub.f32 %v3022_v37, %v1937_v51  ;;  %v1710_v24 = vadd.f32 %v4132_v49, %v1709_v56  ;;  %v2077_v50 = vmul.f32 1.442695, %v2035_v44 }
 0x36e   : > { %v2001_v30 = vmul.f32 %v1969_v19, %v3999_v40  ;;  %v1750_v32 = vmax.f32 %v1710_v24, 0.0  ;;  %2970 = vpow2.f32 %v2077_v50 }
 0x36f   : > { %v1871_v12 = vpop.f32.mrf.mxu1  ;;  %2972 = vpow2.f32 %v2079_v17 }
 0x370   : > { %v2129_v36 = vmul.f32 %v2967_v61, %v2001_v30  ;;  %v1872_v55 = vadd.f32 %v4265_v29, %v1871_v12  ;;  %v3025_v12 = vld [vmem:[%s3653_s12 + $0x58] sm:$0xff] }
 0x372   : > { %v2161_v4 = vadd.f32 %v2129_v36, %v3786_v53  ;;  %v1938_v28 = vmul.f32 %v1872_v55, %v3999_v40 }
 0x373   : > { %v1711_v34 = vpop.f32.mrf.mxu0 }
 0x374   : > { %2193 = vst [vmem:[%s4278_s6 + $0x40] sm:$0xff] %v2161_v4  ;;  %v1970_v63 = vsub.f32 %v3023_v8, %v1938_v28  ;;  %v1712_v46 = vadd.f32 %v4132_v49, %v1711_v34  ;;  %v2971_v51 = vpop.eup %2970 }
 0x376   : > { %v2002_v5 = vmul.f32 %v1970_v63, %v3999_v40  ;;  %v1751_v18 = vmax.f32 %v1712_v46, 0.0  ;;  %v2038_v46 = vsub.f32 0.0, %v4110_v16 }
 0x377   : > { %v1874_v41 = vpop.f32.mrf.mxu1 }
 0x378   : > { %v2130_v53 = vmul.f32 %v2969_v11, %v2002_v5  ;;  %v1769_v62 = vpack.c.bf16 %v1751_v18, %v1750_v32  ;;  %v1875_v23 = vadd.f32 %v4265_v29, %v1874_v41  ;;  %v3026_v18 = vld [vmem:[%s3653_s12 + $0x60] sm:$0xff]  ;;  %v2083_v41 = vmul.f32 1.442695, %v2038_v46 }
 0x37a   : > { %v2162_v27 = vadd.f32 %v2130_v53, %v3789_v54  ;;  %v1939_v31 = vmul.f32 %v1875_v23, %v3999_v40  ;;  %1913 = vmatmul.bf16.gmra.mxu1 %v1769_v62  ;;  %v2037_v54 = vsub.f32 0.0, %v4102_v38  ;;  %v2973_v38 = vpop.eup %2972 }
 0x37b   : > { %v1714_v43 = vpop.f32.mrf.mxu0 }
 0x37c   : > { %2194 = vst [vmem:[%s4278_s6 + $0x48] sm:$0xff] %v2162_v27  ;;  %v1971_v33 = vsub.f32 %v3024_v3, %v1939_v31  ;;  %v1715_v13 = vadd.f32 %v4132_v49, %v1714_v43  ;;  %v2081_v44 = vmul.f32 1.442695, %v2037_v54 }
 0x37e   : > { %v2003_v57 = vmul.f32 %v1971_v33, %v3999_v40  ;;  %v1752_v4 = vmax.f32 %v1715_v13, 0.0  ;;  %2974 = vpow2.f32 %v2081_v44  ;;  %v3027_v33 = vld [vmem:[%s3653_s12 + $0x68] sm:$0xff] }
 0x37f   : > { %v1876_v56 = vpop.f32.mrf.mxu1  ;;  %2976 = vpow2.f32 %v2083_v41  ;;  %v3030_v41 = vld [vmem:[%s3653_s12 + $0x80] sm:$0xff] }
 0x380   : > { %v2131_v37 = vmul.f32 %v2971_v51, %v2003_v57  ;;  %v1877_v19 = vadd.f32 %v4265_v29, %v1876_v56 }
 0x382   : > { %v2163_v39 = vadd.f32 %v2131_v37, %v3812_v0  ;;  %v1940_v30 = vmul.f32 %v1877_v19, %v3999_v40 }
 0x383   : > { %v1716_v61 = vpop.f32.mrf.mxu0 }
 0x384   : > { %2195 = vst [vmem:[%s4278_s6 + $0x50] sm:$0xff] %v2163_v39  ;;  %v1972_v36 = vsub.f32 %v3025_v12, %v1940_v30  ;;  %v1717_v55 = vadd.f32 %v4132_v49, %v1716_v61  ;;  %v2975_v62 = vpop.eup %2974  ;;  %v2040_v30 = vsub.f32 0.0, %v4124_v9  ;;  %v3028_v12 = vld [vmem:[%s3653_s12 + $0x70] sm:$0xff] }
 0x386   : > { %v2004_v24 = vmul.f32 %v1972_v36, %v3999_v40  ;;  %v1753_v28 = vmax.f32 %v1717_v55, 0.0  ;;  %v2087_v55 = vmul.f32 1.442695, %v2040_v30 }
 0x387   : > { %v1879_v34 = vpop.f32.mrf.mxu1 }
 0x388   : > { %v2132_v0 = vmul.f32 %v2973_v38, %v2004_v24  ;;  %v1770_v8 = vpack.c.bf16 %v1753_v28, %v1752_v4  ;;  %v1880_v63 = vadd.f32 %v4265_v29, %v1879_v34 }
 0x38a   : > { %v2164_v50 = vadd.f32 %v2132_v0, %v3815_v1  ;;  %v1941_v32 = vmul.f32 %v1880_v63, %v3999_v40  ;;  %1918 = vmatmul.bf16.gmra.mxu1 %v1770_v8  ;;  %v2039_v1 = vsub.f32 0.0, %v4117_v48  ;;  %v2977_v48 = vpop.eup %2976  ;;  %v3029_v0 = vld [vmem:[%s3653_s12 + $0x78] sm:$0xff] }
 0x38b   : > { %v1719_v5 = vpop.f32.mrf.mxu0 }
 0x38c   : > { %2196 = vst [vmem:[%s4278_s6 + $0x58] sm:$0xff] %v2164_v50  ;;  %v1973_v11 = vsub.f32 %v3026_v18, %v1941_v32  ;;  %v1720_v31 = vadd.f32 %v4132_v49, %v1719_v5  ;;  %v2085_v51 = vmul.f32 1.442695, %v2039_v1  ;;  %v2043_v1 = vsub.f32 0.0, %v4152_v6 }
 0x38e   : > { %v2005_v53 = vmul.f32 %v1973_v11, %v3999_v40  ;;  %v1754_v56 = vmax.f32 %v1720_v31, 0.0  ;;  %2978 = vpow2.f32 %v2085_v51 }
 0x38f   : > { %v1881_v23 = vpop.f32.mrf.mxu1  ;;  %2980 = vpow2.f32 %v2087_v55 }
 0x390   : > { %v2133_v60 = vmul.f32 %v2975_v62, %v2005_v53  ;;  %v1882_v27 = vadd.f32 %v4265_v29, %v1881_v23 }
 0x392   : > { %v2165_v16 = vadd.f32 %v2133_v60, %v3838_v20  ;;  %v1942_v43 = vmul.f32 %v1882_v27, %v3999_v40 }
 0x393   : > { %v1721_v3 = vpop.f32.mrf.mxu0 }
 0x394   : > { %2197 = vst [vmem:[%s4278_s6 + $0x60] sm:$0xff] %v2165_v16  ;;  %v1974_v17 = vsub.f32 %v3027_v33, %v1942_v43  ;;  %v1722_v57 = vadd.f32 %v4132_v49, %v1721_v3  ;;  %v2979_v4 = vpop.eup %2978 }
 0x395   : > { %v2981_v50 = vpop.eup %2980 }
 0x396   : > { %v2006_v37 = vmul.f32 %v1974_v17, %v3999_v40  ;;  %v1755_v19 = vmax.f32 %v1722_v57, 0.0 }
 0x397   : > { %v1884_v54 = vpop.f32.mrf.mxu1 }
 0x398   : > { %v2134_v20 = vmul.f32 %v2977_v48, %v2006_v37  ;;  %v1771_v39 = vpack.c.bf16 %v1755_v19, %v1754_v56  ;;  %v1885_v13 = vadd.f32 %v4265_v29, %v1884_v54 }
 0x39a   : > { %v2166_v61 = vadd.f32 %v2134_v20, %v3841_v21  ;;  %v1943_v49 = vmul.f32 %v1885_v13, %v3999_v40  ;;  %1923 = vmatmul.bf16.gmra.mxu1 %v1771_v39  ;;  %v2041_v21 = vsub.f32 0.0, %v4136_v10 }
 0x39c   : > { %2198 = vst [vmem:[%s4278_s6 + $0x68] sm:$0xff] %v2166_v61  ;;  %v1975_v36 = vsub.f32 %v3028_v12, %v1943_v49  ;;  %v2089_v63 = vmul.f32 1.442695, %v2041_v21 }
 0x39e   : > { %v2007_v44 = vmul.f32 %v1975_v36, %v3999_v40  ;;  %2982 = vpow2.f32 %v2089_v63 }
 0x39f   : > { %v1886_v24 = vpop.f32.mrf.mxu1 }
 0x3a0   : > { %v2135_v28 = vmul.f32 %v2979_v4, %v2007_v44  ;;  %v1887_v38 = vadd.f32 %v4265_v29, %v1886_v24 }
 0x3a2   : > { %v2167_v9 = vadd.f32 %v2135_v28, %v3864_v52  ;;  %v1944_v34 = vmul.f32 %v1887_v38, %v3999_v40  ;;  %v2042_v52 = vsub.f32 0.0, %v4145_v58 }
 0x3a4   : > { %2199 = vst [vmem:[%s4278_s6 + $0x70] sm:$0xff] %v2167_v9  ;;  %v1976_v8 = vsub.f32 %v3029_v0, %v1944_v34  ;;  %v2091_v62 = vmul.f32 1.442695, %v2042_v52  ;;  %v2983_v60 = vpop.eup %2982 }
 0x3a6   : > { %v2008_v46 = vmul.f32 %v1976_v8, %v3999_v40  ;;  %2984 = vpow2.f32 %v2091_v62 }
 0x3a7   : > { %v1889_v32 = vpop.f32.mrf.mxu1 }
 0x3a8   : > { %v2136_v5 = vmul.f32 %v2981_v50, %v2008_v46  ;;  %v1890_v18 = vadd.f32 %v4265_v29, %v1889_v32 }
 0x3aa   : > { %v2168_v10 = vadd.f32 %v2136_v5, %v3867_v59  ;;  %v1945_v11 = vmul.f32 %v1890_v18, %v3999_v40 }
 0x3ac   : > { %2200 = vst [vmem:[%s4278_s6 + $0x78] sm:$0xff] %v2168_v10  ;;  %v1977_v53 = vsub.f32 %v3030_v41, %v1945_v11 }
 0x3ae   : > { %v2009_v23 = vmul.f32 %v1977_v53, %v3999_v40 }
 0x3af   : > { %v1891_v58 = vpop.f32.mrf.mxu1 }
 0x3b0   : > { %v2137_v59 = vmul.f32 %v2983_v60, %v2009_v23  ;;  %v1892_v27 = vadd.f32 %v4265_v29, %v1891_v58 }
 0x3b1   : > { %3313 = shalt.err (!%p3310_p9)
}
 0x3b2   : > { %s3413_s4 = smov 128   ;;  %s3414_s1 = smov 8   ;;  %v2169_v6 = vadd.f32 %v2137_v59, %v3688_v14  ;;  %v1946_v16 = vmul.f32 %v1892_v27, %v3999_v40  ;;  %v3031_v31 = vld [vmem:[%s3653_s12 + $0x88] sm:$0xff]  ;;  %v2093_v3 = vmul.f32 1.442695, %v2043_v1  ;;  %v2985_v17 = vpop.eup %2984  ;;  %v2044_v37 = vsub.f32 0.0, %v4161_v47 }
 0x3b3   : > { %2782 = dma.vmem_to_hbm [thread:$0]  (%p3613_p0), %s2285_s23, 4096, %s2287_s24, %s2255_s17, %s3413_s4, %s3413_s4, %s3414_s1   ;;  %v2045_v47 = vsub.f32 0.0, %v4168_v22  ;;  %v2046_v22 = vsub.f32 0.0, %v4177_v42  ;;  %v2047_v42 = vsub.f32 0.0, %v4184_v2  ;;  %v4647_v58 = vld [vmem:[#allocation37_spill] sm:$0xff]  ;;  %v4648_v59 = vld [vmem:[#allocation26_spill] sm:$0xff] }
 0x3b4   : > { %2201 = vst [vmem:[%s4278_s6 + $0x80] sm:$0xff] %v2169_v6  ;;  %v1978_v43 = vsub.f32 %v3031_v31, %v1946_v16  ;;  %2986 = vpow2.f32 %v2093_v3  ;;  %v3032_v48 = vld [vmem:[%s3653_s12 + $0x90] sm:$0xff]  ;;  %v2095_v20 = vmul.f32 1.442695, %v2044_v37  ;;  %v3033_v36 = vld [vmem:[%s3653_s12 + $0x98] sm:$0xff]  ;;  %v3034_v34 = vld [vmem:[%s3653_s12 + $0xa0] sm:$0xff] }
 0x3b5   : > { %v2097_v44 = vmul.f32 1.442695, %v2045_v47  ;;  %v2099_v8 = vmul.f32 1.442695, %v2046_v22  ;;  %v3035_v52 = vld [vmem:[%s3653_s12 + $0xa8] sm:$0xff]  ;;  %v2048_v2 = vsub.f32 0.0, %v4647_v58 }
 0x3b6   : > { %v2010_v33 = vmul.f32 %v1978_v43, %v3999_v40  ;;  %2988 = vpow2.f32 %v2095_v20  ;;  %v2101_v11 = vmul.f32 1.442695, %v2047_v42  ;;  %v3036_v1 = vld [vmem:[%s3653_s12 + $0xb0] sm:$0xff]  ;;  %s4664_s23 = sshll.u32 %s3519_s25, 8  ;;  %s4665_s8 = sld [smem:[#allocation52_spill]] }
 0x3b7   : > { %v1894_v57 = vpop.f32.mrf.mxu1  ;;  %2990 = vpow2.f32 %v2097_v44  ;;  %v2103_v16 = vmul.f32 1.442695, %v2048_v2  ;;  %s2267_s10 = sshll.u32 %s4278_s6, 4  ;;  %s2250_s28 = scalar_lea.sflag [#allocation4], %s3646_s22  ;;  %s2268_s10 = int_to_ptr.vmem [resolvable:$true] %s2267_s10 }
 0x3b8   : > { %v2138_v51 = vmul.f32 %v2985_v17, %v2010_v33  ;;  %v1895_v56 = vadd.f32 %v4265_v29, %v1894_v57  ;;  %2992 = vpow2.f32 %v2099_v8  ;;  %v4649_v57 = vld [vmem:[#allocation38_spill] sm:$0xff] }
 0x3b9   : > { %2994 = vpow2.f32 %v2101_v11  ;;  %v4656_v11 = vld [vmem:[#allocation30_spill] sm:$0xff] }
 0x3ba   : > { %v2170_v14 = vadd.f32 %v2138_v51, %v3691_v15  ;;  %v1947_v19 = vmul.f32 %v1895_v56, %v3999_v40  ;;  %v2987_v13 = vpop.eup %2986  ;;  %2996 = vpow2.f32 %v2103_v16  ;;  %v2049_v51 = vsub.f32 0.0, %v4649_v57  ;;  %v4650_v56 = vld [vmem:[#allocation27_spill] sm:$0xff] }
 0x3bb   : > { %v4658_v16 = vld [vmem:[#allocation31_spill] sm:$0xff] }
 0x3bc   : > { %2202 = vst [vmem:[%s4278_s6 + $0x88] sm:$0xff] %v2170_v14  ;;  %v1979_v54 = vsub.f32 %v3032_v48, %v1947_v19  ;;  %v2989_v24 = vpop.eup %2988  ;;  %v3037_v19 = vld [vmem:[%s3653_s12 + $0xb8] sm:$0xff]  ;;  %s2266_s14 = scalar_lea.hbm %s4665_s8, %s4664_s23  ;;  %s3334_s23 = scalar_lea.hbm %s4665_s8, 512 }
 0x3bd   : > { %v2991_v46 = vpop.eup %2990  ;;  %s2269_s2 = sshll.u32 %s2266_s14, 4  ;;  %s2270_s2 = int_to_ptr.hbm [resolvable:$true] %s2269_s2 }
 0x3be   : > { %v2011_v39 = vmul.f32 %v1979_v54, %v3999_v40  ;;  %v2993_v53 = vpop.eup %2992  ;;  %v2105_v54 = vmul.f32 1.442695, %v2049_v51 }
 0x3bf   : > { %v1896_v30 = vpop.f32.mrf.mxu1  ;;  %v2995_v43 = vpop.eup %2994 }
 0x3c0   : > { %v2139_v61 = vmul.f32 %v2987_v13, %v2011_v39  ;;  %v1897_v49 = vadd.f32 %v4265_v29, %v1896_v30  ;;  %v2997_v39 = vpop.eup %2996  ;;  %2998 = vpow2.f32 %v2105_v54 }
 0x3c2   : > { %v2171_v15 = vadd.f32 %v2139_v61, %v3714_v25  ;;  %v1948_v12 = vmul.f32 %v1897_v49, %v3999_v40  ;;  %v4651_v49 = vld [vmem:[#allocation39_spill] sm:$0xff] }
 0x3c3   : > { %v2050_v47 = vsub.f32 0.0, %v4651_v49 }
 0x3c4   : > { %2203 = vst [vmem:[%s4278_s6 + $0x90] sm:$0xff] %v2171_v15  ;;  %v1980_v55 = vsub.f32 %v3033_v36, %v1948_v12  ;;  %v4652_v15 = vld [vmem:[#allocation28_spill] sm:$0xff] }
 0x3c6   : > { %v2012_v4 = vmul.f32 %v1980_v55, %v3999_v40  ;;  %v3038_v55 = vld [vmem:[%s3653_s12 + $0xc0] sm:$0xff] }
 0x3c7   : > { %v1899_v28 = vpop.f32.mrf.mxu1 }
 0x3c8   : > { %v2140_v38 = vmul.f32 %v2989_v24, %v2012_v4  ;;  %v1900_v21 = vadd.f32 %v4265_v29, %v1899_v28  ;;  %v2107_v4 = vmul.f32 1.442695, %v2050_v47  ;;  %v2999_v28 = vpop.eup %2998 }
 0x3ca   : > { %v2172_v25 = vadd.f32 %v2140_v38, %v3717_v26  ;;  %v1949_v9 = vmul.f32 %v1900_v21, %v3999_v40  ;;  %3000 = vpow2.f32 %v2107_v4  ;;  %v3043_v4 = vld [vmem:[%s3653_s12 + $0xe8] sm:$0xff] }
 0x3cc   : > { %2204 = vst [vmem:[%s4278_s6 + $0x98] sm:$0xff] %v2172_v25  ;;  %v1981_v0 = vsub.f32 %v3034_v34, %v1949_v9  ;;  %v4653_v25 = vld [vmem:[#allocation40_spill] sm:$0xff]  ;;  %v4654_v34 = vld [vmem:[#allocation29_spill] sm:$0xff] }
 0x3cd   : > { %v2051_v9 = vsub.f32 0.0, %v4653_v25 }
 0x3ce   : > { %v2013_v63 = vmul.f32 %v1981_v0, %v3999_v40 }
 0x3cf   : > { %v1901_v50 = vpop.f32.mrf.mxu1 }
 0x3d0   : > { %v2141_v32 = vmul.f32 %v2991_v46, %v2013_v63  ;;  %v1902_v5 = vadd.f32 %v4265_v29, %v1901_v50  ;;  %v3039_v63 = vld [vmem:[%s3653_s12 + $0xc8] sm:$0xff]  ;;  %v2109_v50 = vmul.f32 1.442695, %v2051_v9 }
 0x3d2   : > { %v2173_v26 = vadd.f32 %v2141_v32, %v3740_v35  ;;  %v1950_v18 = vmul.f32 %v1902_v5, %v3999_v40  ;;  %v3001_v5 = vpop.eup %3000  ;;  %3002 = vpow2.f32 %v2109_v50 }
 0x3d4   : > { %2205 = vst [vmem:[%s4278_s6 + $0xa0] sm:$0xff] %v2173_v26  ;;  %v1982_v10 = vsub.f32 %v3035_v52, %v1950_v18  ;;  %v4655_v52 = vld [vmem:[#allocation41_spill] sm:$0xff] }
 0x3d6   : > { %v2014_v41 = vmul.f32 %v1982_v10, %v3999_v40  ;;  %v2052_v10 = vsub.f32 0.0, %v4655_v52 }
 0x3d7   : > { %v1904_v62 = vpop.f32.mrf.mxu1 }
 0x3d8   : > { %v2142_v23 = vmul.f32 %v2993_v53, %v2014_v41  ;;  %v1905_v60 = vadd.f32 %v4265_v29, %v1904_v62  ;;  %v3040_v62 = vld [vmem:[%s3653_s12 + $0xd0] sm:$0xff]  ;;  %v3003_v2 = vpop.eup %3002 }
 0x3da   : > { %v2174_v35 = vadd.f32 %v2142_v23, %v4648_v59  ;;  %v1951_v27 = vmul.f32 %v1905_v60, %v3999_v40  ;;  %v2111_v60 = vmul.f32 1.442695, %v2052_v10  ;;  %v4663_v10 = vld [vmem:[#allocation35_spill] sm:$0xff] }
 0x3dc   : > { %2206 = vst [vmem:[%s4278_s6 + $0xa8] sm:$0xff] %v2174_v35  ;;  %v1983_v6 = vsub.f32 %v3036_v1, %v1951_v27  ;;  %3004 = vpow2.f32 %v2111_v60  ;;  %v4657_v1 = vld [vmem:[#allocation42_spill] sm:$0xff] }
 0x3de   : > { %v2015_v31 = vmul.f32 %v1983_v6, %v3999_v40  ;;  %v2053_v6 = vsub.f32 0.0, %v4657_v1 }
 0x3df   : > { %v1906_v3 = vpop.f32.mrf.mxu1 }
 0x3e0   : > { %v2143_v33 = vmul.f32 %v2995_v43, %v2015_v31  ;;  %v1907_v17 = vadd.f32 %v4265_v29, %v1906_v3  ;;  %v3041_v3 = vld [vmem:[%s3653_s12 + $0xd8] sm:$0xff] }
 0x3e2   : > { %v2175_v37 = vadd.f32 %v2143_v33, %v4650_v56  ;;  %v1952_v14 = vmul.f32 %v1907_v17, %v3999_v40  ;;  %v2113_v17 = vmul.f32 1.442695, %v2053_v6  ;;  %v3005_v51 = vpop.eup %3004 }
 0x3e4   : > { %2207 = vst [vmem:[%s4278_s6 + $0xb0] sm:$0xff] %v2175_v37  ;;  %v1984_v48 = vsub.f32 %v3037_v19, %v1952_v14  ;;  %3006 = vpow2.f32 %v2113_v17  ;;  %v2054_v19 = vsub.f32 0.0, %v4241_v7  ;;  %v2055_v7 = vsub.f32 0.0, %v4248_v45 }
 0x3e6   : > { %v2016_v20 = vmul.f32 %v1984_v48, %v3999_v40  ;;  %v4659_v48 = vld [vmem:[#allocation32_spill] sm:$0xff] }
 0x3e7   : > { %v1909_v13 = vpop.f32.mrf.mxu1 }
 0x3e8   : > { %v2144_v30 = vmul.f32 %v2997_v39, %v2016_v20  ;;  %v1910_v61 = vadd.f32 %v4265_v29, %v1909_v13  ;;  %v3042_v39 = vld [vmem:[%s3653_s12 + $0xe0] sm:$0xff] }
 0x3ea   : > { %v2176_v12 = vadd.f32 %v2144_v30, %v4652_v15  ;;  %v1953_v36 = vmul.f32 %v1910_v61, %v3999_v40  ;;  %v2115_v30 = vmul.f32 1.442695, %v2054_v19  ;;  %v3007_v49 = vpop.eup %3006 }
 0x3ec   : > { %2208 = vst [vmem:[%s4278_s6 + $0xb8] sm:$0xff] %v2176_v12  ;;  %v1985_v44 = vsub.f32 %v3038_v55, %v1953_v36  ;;  %3008 = vpow2.f32 %v2115_v30  ;;  %v4660_v36 = vld [vmem:[#allocation33_spill] sm:$0xff] }
 0x3ee   : > { %v2017_v24 = vmul.f32 %v1985_v44, %v3999_v40 }
 0x3ef   : > { %v1911_v38 = vpop.f32.mrf.mxu1 }
 0x3f0   : > { %v2145_v21 = vmul.f32 %v2999_v28, %v2017_v24  ;;  %v1912_v22 = vadd.f32 %v4265_v29, %v1911_v38  ;;  %v2117_v28 = vmul.f32 1.442695, %v2055_v7 }
 0x3f2   : > { %v2177_v0 = vadd.f32 %v2145_v21, %v4654_v34  ;;  %v1954_v8 = vmul.f32 %v1912_v22, %v3999_v40  ;;  %v3009_v21 = vpop.eup %3008  ;;  %3010 = vpow2.f32 %v2117_v28  ;;  %v4661_v34 = vld [vmem:[#allocation43_spill] sm:$0xff] }
 0x3f3   : > { %v2056_v45 = vsub.f32 0.0, %v4661_v34 }
 0x3f4   : > { %2209 = vst [vmem:[%s4278_s6 + $0xc0] sm:$0xff] %v2177_v0  ;;  %v1986_v46 = vsub.f32 %v3039_v63, %v1954_v8  ;;  %v4662_v0 = vld [vmem:[#allocation34_spill] sm:$0xff] }
 0x3f6   : > { %v2018_v32 = vmul.f32 %v1986_v46, %v3999_v40  ;;  %v3044_v46 = vld [vmem:[%s3653_s12 + $0xf0] sm:$0xff] }
 0x3f7   : > { %v1914_v42 = vpop.f32.mrf.mxu1 }
 0x3f8   : > { %v2146_v26 = vmul.f32 %v3001_v5, %v2018_v32  ;;  %v1915_v18 = vadd.f32 %v4265_v29, %v1914_v42  ;;  %v2119_v32 = vmul.f32 1.442695, %v2056_v45  ;;  %v3011_v42 = vpop.eup %3010 }
 0x3fa   : > { %v2178_v41 = vadd.f32 %v2146_v26, %v4656_v11  ;;  %v1955_v53 = vmul.f32 %v1915_v18, %v3999_v40  ;;  %3012 = vpow2.f32 %v2119_v32 }
 0x3fc   : > { %2210 = vst [vmem:[%s4278_s6 + $0xc8] sm:$0xff] %v2178_v41  ;;  %v1987_v23 = vsub.f32 %v3040_v62, %v1955_v53  ;;  %v3045_v53 = vld [vmem:[%s3653_s12 + $0xf8] sm:$0xff]  ;;  %s3328_s12 = sshra.s32 %s2270_s2, 4  ;;  %s3329_s12 = int_to_ptr.hbm [resolvable:$true] %s3328_s12 }
 0x3fd   : > { %s3330_s25 = scalar_lea.hbm %s3329_s12, 256  ;;  %p3335_p2 = scmp.lt.s32.totalorder %s3329_s12, %s4665_s8 }
 0x3fe   : > { %v2019_v58 = vmul.f32 %v1987_v23, %v3999_v40  ;;  %p3331_p10 = scmp.ne.s32.totalorder %s3329_s12, %s3330_s25  ;;  %p3336_p5 = scmp.lt.s32.totalorder %s3334_s23, %s3330_s25 }
 0x3ff   : > { %v1916_v59 = vpop.f32.mrf.mxu1 }
 0x400   : > { %v2147_v35 = vmul.f32 %v3003_v2, %v2019_v58  ;;  %v1917_v27 = vadd.f32 %v4265_v29, %v1916_v59  ;;  %v3013_v60 = vpop.eup %3012  ;;  %v4666_v58 = vld [vmem:[#allocation36_spill] sm:$0xff]  ;;  %p3332_p11 = pnand %p3331_p10, %p3613_p0  ;;  %p3337_p1 = por %p3336_p5, %p3335_p2 }
 0x402   : > { %v2179_v31 = vadd.f32 %v2147_v35, %v4658_v16  ;;  %v1956_v43 = vmul.f32 %v1917_v27, %v3999_v40  ;;  %p3333_p12 = pneg %p3332_p11 }
 0x404   : > { %2211 = vst [vmem:[%s4278_s6 + $0xd0] sm:$0xff] %v2179_v31  ;;  %v1988_v33 = vsub.f32 %v3041_v3, %v1956_v43  ;;  %p3338_p3 = pnand %p3337_p1, %p3333_p12 }
 0x406   : > { %v2020_v57 = vmul.f32 %v1988_v33, %v3999_v40 }
 0x407   : > { %v1919_v56 = vpop.f32.mrf.mxu1 }
 0x408   : > { %v2148_v37 = vmul.f32 %v3005_v51, %v2020_v57  ;;  %v1920_v14 = vadd.f32 %v4265_v29, %v1919_v56 }
 0x40a   : > { %v2180_v54 = vadd.f32 %v2148_v37, %v4659_v48  ;;  %v1957_v20 = vmul.f32 %v1920_v14, %v3999_v40 }
 0x40c   : > { %2212 = vst [vmem:[%s4278_s6 + $0xd8] sm:$0xff] %v2180_v54  ;;  %v1989_v13 = vsub.f32 %v3042_v39, %v1957_v20 }
 0x40e   : > { %v2021_v61 = vmul.f32 %v1989_v13, %v3999_v40 }
 0x40f   : > { %v1921_v47 = vpop.f32.mrf.mxu1 }
 0x410   : > { %v2149_v15 = vmul.f32 %v3007_v49, %v2021_v61  ;;  %v1922_v12 = vadd.f32 %v4265_v29, %v1921_v47 }
 0x412   : > { %v2181_v55 = vadd.f32 %v2149_v15, %v4660_v36  ;;  %v1958_v44 = vmul.f32 %v1922_v12, %v3999_v40 }
 0x414   : > { %2213 = vst [vmem:[%s4278_s6 + $0xe0] sm:$0xff] %v2181_v55  ;;  %v1990_v24 = vsub.f32 %v3043_v4, %v1958_v44 }
 0x416   : > { %v2022_v38 = vmul.f32 %v1990_v24, %v3999_v40 }
 0x417   : > { %v1924_v22 = vpop.f32.mrf.mxu1 }
 0x418   : > { %v2150_v25 = vmul.f32 %v3009_v21, %v2022_v38  ;;  %v1925_v9 = vadd.f32 %v4265_v29, %v1924_v22 }
 0x41a   : > { %v2182_v8 = vadd.f32 %v2150_v25, %v4662_v0  ;;  %v1959_v63 = vmul.f32 %v1925_v9, %v3999_v40 }
 0x41c   : > { %2214 = vst [vmem:[%s4278_s6 + $0xe8] sm:$0xff] %v2182_v8  ;;  %v1991_v50 = vsub.f32 %v3044_v46, %v1959_v63 }
 0x41e   : > { %v2023_v5 = vmul.f32 %v1991_v50, %v3999_v40 }
 0x41f   : > { %v1926_v26 = vpop.f32.mrf.mxu1 }
 0x420   : > { %v2151_v18 = vmul.f32 %v3011_v42, %v2023_v5  ;;  %v1927_v52 = vadd.f32 %v4265_v29, %v1926_v26 }
 0x422   : > { %v2183_v11 = vadd.f32 %v2151_v18, %v4663_v10  ;;  %v1960_v41 = vmul.f32 %v1927_v52, %v3999_v40 }
 0x424   : > { %2215 = vst [vmem:[%s4278_s6 + $0xf0] sm:$0xff] %v2183_v11  ;;  %v1992_v62 = vsub.f32 %v3045_v53, %v1960_v41 }
 0x426   : > { %v2024_v23 = vmul.f32 %v1992_v62, %v3999_v40 }
 0x428   : > { %v2152_v29 = vmul.f32 %v3013_v60, %v2024_v23 }
 0x42a   : > { %v2184_v2 = vadd.f32 %v2152_v29, %v4666_v58 }
 0x42c   : > { %2216 = vst [vmem:[%s4278_s6 + $0xf8] sm:$0xff] %v2184_v2 }
 0x42d   : > { %3341 = shalt.err (!%p3338_p3)
}
 0x42e   : > { %2781 = dma.vmem_to_hbm [thread:$0]  (%p3613_p0), %s2268_s10, 4096, %s2270_s2, %s2250_s28, %s3413_s4, %s3413_s4, %s3414_s1  }
 0x42f PF: > { %s2301_s22 = sand.u32 1, %s3388_s18   ;;  %p4667_p4 = scmp.ge.s32.totalorder %s3400_s21, 2 }
 0x430   : > { %s2302_s6 = scalar_lea.sflag [#allocation4], %s2301_s22 }
 0x431   : > { %p2812_p13 = pnand %p4667_p4, %p3619_p6 }
 0x433   : > { %p2813_p7 = pneg %p2812_p13 }
 0x435   : > { %3379 = dma.done.wait (%p2813_p7), %s2302_s6, 4096  }
 0x436   : > { %3381 = vsyncadd (%p2813_p7), %s2302_s6, 4294963200  ;;  %s2312_s14 = scalar_lea.sflag [#allocation18], %s2301_s22 }
 0x437   : > { %3383 = dma.done.wait (%p2813_p7), %s2312_s14, 4096  }
 0x438   : > { %3385 = vsyncadd (%p2813_p7), %s2312_s14, 4294963200  ;;  %p36_p0 = scmp.ge.s32.totalorder %s3589_s15, 4   ;;  %s4668_s18 = smov %s3392_s19 }
 0x439   : > { %s4669_s19 = smov %s3396_s20  ;;  %s4670_s20 = smov %s3601_s16 }
 0x43a   : > { %s4671_s21 = smov %s3589_s15  ;;  %38 = sbr.rel (!%p36_p0) target bundleno = 22 (0x16), region = 166 }
 0x43f   :  { %2318 = vsyncpa [#allocation3], 1 }
 0x440   :  { %2320 = vsyncpa [#allocation3 + $0x1], 1 }
 0x441   :  { %2321 = vsyncpa [#allocation6], 1 }
 0x442   :  { %2322 = vsyncpa [#allocation9], 1 }
 0x443   :  { %2323 = vsyncpa [#allocation12], 1 }
 0x444   :  { %2324 = vsyncpa [#allocation15], 1 }
 0x445   :  { %2325 = vsyncpa [#allocation4], 1 }
 0x446   :  { %2327 = vsyncpa [#allocation4 + $0x1], 1 }
 0x447   :  { %2328 = vsyncpa [#allocation18], 1 }
 0x448   :  { %2330 = vsyncpa [#allocation18 + $0x1], 1 }

</bundles_post_ra>
